<compile_context>
chip_gen: v6e
topology: v6e:2x2x1
jax: 0.10.0
libtpu: 0.0.40
codegen_flags: <defaults>
</compile_context>

<pallas_src>
import functools

import jax
import jax.numpy as jnp
from jax.experimental import pallas as pl
from jax.experimental.pallas import tpu as pltpu

LN_EPS = 1e-6
NEG_INF = -1e9


def _layer_norm(x, gamma, beta):
    # Matches nn.LayerNorm(d_model, eps=1e-6): biased variance over last dim.
    mean = jnp.mean(x, axis=-1, keepdims=True)
    var = jnp.mean((x - mean) ** 2, axis=-1, keepdims=True)
    return (x - mean) * jax.lax.rsqrt(var + LN_EPS) * gamma + beta


def _split_heads(p, n_head, hd):
    # (L, H*hd) -> (H, hd, L): 2-D minor transpose + leading-dim split
    # (the minor dim stays intact, so the reshape is layout-free).
    L = p.shape[0]
    return p.T.reshape(n_head, hd, L)


def _mha_block(x_q, x_kv, mask, wq, wk, wv, wo, gamma, beta, *,
               n_head, d_k, d_v):
    """One multi-head attention sub-layer on a single batch element.

    x_q: (T, D) f32, x_kv: (S, D) f32, mask: (T, S) f32 (0 == masked out),
    wq/wk: (D, H*d_k), wv: (D, H*d_v), wo: (H*d_v, D), gamma/beta: (1, D).
    Returns (LN(out + residual), attn (H, T, S) f32).
    """
    T = x_q.shape[0]
    residual = x_q

    # Full-width projections: one MXU dot each (contraction D, output H*d_k).
    qp = jnp.dot(x_q, wq, preferred_element_type=jnp.float32)     # (T, H*dk)
    kp = jnp.dot(x_kv, wk, preferred_element_type=jnp.float32)    # (S, H*dk)
    vp = jnp.dot(x_kv, wv, preferred_element_type=jnp.float32)    # (S, H*dv)

    # Fold the softmax temperature (sqrt(d_k)) once for every head.
    qp = qp * (1.0 / (d_k ** 0.5))

    # Split heads.
    qh_t = _split_heads(qp, n_head, d_k)        # (H, dk, T)
    kh_t = _split_heads(kp, n_head, d_k)        # (H, dk, S)
    vh_t = _split_heads(vp, n_head, d_v)        # (H, dv, S)
    qh = jnp.transpose(qh_t, (0, 2, 1))         # (H, T, dk)

    # Head-batched scores, softmax in f32.
    scores = jnp.einsum("htd,hds->hts", qh, kh_t,
                        preferred_element_type=jnp.float32)       # (H, T, S)
    mask_b = jnp.broadcast_to(mask[None, :, :], scores.shape)
    scores = jnp.where(mask_b == 0.0, NEG_INF, scores)            # masked_fill
    scores = scores - jnp.max(scores, axis=-1, keepdims=True)
    e = jnp.exp(scores)
    denom = jnp.sum(e, axis=-1, keepdims=True)
    attn = e / denom                                              # softmax(-1)

    # Head-batched context.
    ctx = jnp.einsum("hts,hds->htd", attn, vh_t,
                     preferred_element_type=jnp.float32)          # (H, T, dv)

    # Merge heads -> (T, H*dv) and do ONE full-width output projection.
    ctx_cat = jnp.transpose(ctx, (0, 2, 1)).reshape(n_head * d_v, T).T
    out = jnp.dot(ctx_cat, wo, preferred_element_type=jnp.float32)  # (T, D)

    out = out + residual                 # dropout(fc(.)) + residual, dropout=id
    return _layer_norm(out, gamma, beta), attn


def _decoder_layer_kernel(n_head, d_k, d_v,
                          dec_ref, enc_ref, smask_ref, cmask_ref,
                          s_wq, s_wk, s_wv, s_wo, s_g, s_b,
                          c_wq, c_wk, c_wv, c_wo, c_g, c_b,
                          f_w1, f_b1, f_w2, f_b2, f_g, f_b,
                          out_ref, slf_attn_ref, enc_attn_ref):
    dec_in = dec_ref[0]                              # (T, D) f32
    enc_out = enc_ref[0]                             # (S, D) f32
    smask = smask_ref[0]                             # (T, T) f32
    cmask = cmask_ref[0]                             # (T, S) f32

    # Self-attention.
    x, slf_attn = _mha_block(dec_in, dec_in, smask,
                             s_wq[...], s_wk[...], s_wv[...], s_wo[...],
                             s_g[...], s_b[...],
                             n_head=n_head, d_k=d_k, d_v=d_v)
    # Cross-attention (activation stays resident in VMEM — no HBM round trip).
    x, enc_attn = _mha_block(x, enc_out, cmask,
                             c_wq[...], c_wk[...], c_wv[...], c_wo[...],
                             c_g[...], c_b[...],
                             n_head=n_head, d_k=d_k, d_v=d_v)

    # Position-wise feed-forward (wide dots, f32 accumulation).
    h = jnp.dot(x, f_w1[...], preferred_element_type=jnp.float32) + f_b1[...]
    h = jnp.maximum(h, 0.0)                                          # ReLU
    y = jnp.dot(h, f_w2[...], preferred_element_type=jnp.float32) + f_b2[...]
    y = y + x                                                        # residual
    out_ref[0] = _layer_norm(y, f_g[...], f_b[...])

    # Single slab store per attention map (no per-head partial stores).
    slf_attn_ref[0] = slf_attn                      # (H, T, T)
    enc_attn_ref[0] = enc_attn                      # (H, T, S)


def _full_spec(shape):
    nd = len(shape)
    return pl.BlockSpec(shape, lambda b: (0,) * nd)


def _batched_spec(shape):
    nd = len(shape)
    return pl.BlockSpec(shape, lambda b: (b,) + (0,) * (nd - 1))


# ----------------------------------------------------------------------------
# DecoderLayer forward: one fused pallas_call over the batch grid.
# ----------------------------------------------------------------------------
def decoder_layer(dec_input, enc_output, params, *, n_head, d_k, d_v, d_inner,
                  slf_attn_mask=None, dec_enc_attn_mask=None):
    dec_input = dec_input.astype(jnp.float32)
    enc_output = enc_output.astype(jnp.float32)
    B, T, D = dec_input.shape
    S = enc_output.shape[1]

    if slf_attn_mask is None:       # None -> no masking (all positions visible)
        slf_attn_mask = jnp.ones((B, T, T), jnp.float32)
    else:
        slf_attn_mask = slf_attn_mask.astype(jnp.float32)
    if dec_enc_attn_mask is None:
        dec_enc_attn_mask = jnp.ones((B, T, S), jnp.float32)
    else:
        dec_enc_attn_mask = dec_enc_attn_mask.astype(jnp.float32)

    f32 = lambda a: a.astype(jnp.float32)
    slf, enc, ffn = params["slf"], params["enc"], params["ffn"]

    operands = [
        dec_input, enc_output, slf_attn_mask, dec_enc_attn_mask,
        f32(slf["wq"]), f32(slf["wk"]), f32(slf["wv"]), f32(slf["wo"]),
        f32(slf["gamma"]), f32(slf["beta"]),
        f32(enc["wq"]), f32(enc["wk"]), f32(enc["wv"]), f32(enc["wo"]),
        f32(enc["gamma"]), f32(enc["beta"]),
        f32(ffn["w1"]), f32(ffn["b1"]), f32(ffn["w2"]), f32(ffn["b2"]),
        f32(ffn["gamma"]), f32(ffn["beta"]),
    ]

    in_specs = [
        _batched_spec((1, T, D)),          # dec_input
        _batched_spec((1, S, D)),          # enc_output
        _batched_spec((1, T, T)),          # slf mask
        _batched_spec((1, T, S)),          # dec-enc mask
    ] + [_full_spec(tuple(op.shape)) for op in operands[4:]]   # params

    out_shape = (
        jax.ShapeDtypeStruct((B, T, D), jnp.float32),
        jax.ShapeDtypeStruct((B, n_head, T, T), jnp.float32),
        jax.ShapeDtypeStruct((B, n_head, T, S), jnp.float32),
    )
    out_specs = (
        _batched_spec((1, T, D)),
        _batched_spec((1, n_head, T, T)),
        _batched_spec((1, n_head, T, S)),
    )

    kernel = functools.partial(_decoder_layer_kernel, n_head, d_k, d_v)
    dec_out, slf_attn, enc_attn = pl.pallas_call(
        kernel,
        out_shape=out_shape,
        grid=(B,),
        in_specs=in_specs,
        out_specs=out_specs,
        compiler_params=pltpu.CompilerParams(
            dimension_semantics=("parallel",),   # batch axis shards across TCs
            vmem_limit_bytes=48 * 1024 * 1024,
        ),
    )(*operands)
    return dec_out, slf_attn, enc_attn


# ----------------------------------------------------------------------------
# Deterministic parameter init (synthetic; no checkpoint loading).
# ----------------------------------------------------------------------------
def init_params(key, d_model, d_inner, n_head, d_k, d_v):
    ks = jax.random.split(key, 10)

    def lin(k, fan_in, fan_out):
        return jax.random.normal(k, (fan_in, fan_out), jnp.float32) / jnp.sqrt(
            jnp.float32(fan_in))

    def mha_p(k4):
        return dict(
            wq=lin(k4[0], d_model, n_head * d_k),
            wk=lin(k4[1], d_model, n_head * d_k),
            wv=lin(k4[2], d_model, n_head * d_v),
            wo=lin(k4[3], n_head * d_v, d_model),
            gamma=jnp.ones((1, d_model), jnp.float32),
            beta=jnp.zeros((1, d_model), jnp.float32),
        )

    return dict(
        slf=mha_p(ks[0:4]),
        enc=mha_p(ks[4:8]),
        ffn=dict(
            w1=lin(ks[8], d_model, d_inner),
            b1=jnp.zeros((1, d_inner), jnp.float32),
            w2=lin(ks[9], d_inner, d_model),
            b2=jnp.zeros((1, d_model), jnp.float32),
            gamma=jnp.ones((1, d_model), jnp.float32),
            beta=jnp.zeros((1, d_model), jnp.float32),
        ),
    )


if __name__ == "__main__":
    # Small shapes consistent with the module's forward.
    B, T_DEC, S_ENC = 2, 8, 8
    D_MODEL, D_INNER, N_HEAD, D_K, D_V = 32, 64, 4, 8, 8

    key = jax.random.PRNGKey(0)
    k_p, k_dec, k_enc = jax.random.split(key, 3)

    params = init_params(k_p, D_MODEL, D_INNER, N_HEAD, D_K, D_V)
    dec_input = jax.random.normal(k_dec, (B, T_DEC, D_MODEL), jnp.float32)
    enc_output = jax.random.normal(k_enc, (B, S_ENC, D_MODEL), jnp.float32)

    # Causal self-attention mask (1 = attend, 0 = masked), full cross-attn mask.
    causal = jnp.tril(jnp.ones((T_DEC, T_DEC), jnp.float32))
    slf_mask = jnp.broadcast_to(causal, (B, T_DEC, T_DEC))
    dec_enc_mask = jnp.ones((B, T_DEC, S_ENC), jnp.float32)

    dec_out, slf_attn, enc_attn = decoder_layer(
        dec_input, enc_output, params,
        n_head=N_HEAD, d_k=D_K, d_v=D_V, d_inner=D_INNER,
        slf_attn_mask=slf_mask, dec_enc_attn_mask=dec_enc_mask)

    jax.block_until_ready((dec_out, slf_attn, enc_attn))
    assert dec_out.shape == (B, T_DEC, D_MODEL)
    assert slf_attn.shape == (B, N_HEAD, T_DEC, T_DEC)
    assert enc_attn.shape == (B, N_HEAD, T_DEC, S_ENC)
    assert bool(jnp.all(jnp.isfinite(dec_out)))
    # Attention rows must sum to 1 and respect the causal mask.
    assert bool(jnp.allclose(jnp.sum(slf_attn, axis=-1), 1.0, atol=1e-3))
    assert bool(jnp.all(slf_attn[:, :, 0, 1:] < 1e-6))
    print("KERNEL_OK")
</pallas_src>

<mosaic_0001>
module attributes {stable_mosaic.version = 11 : i64} {
  func.func @_decoder_layer_kernel(%arg0: i32, %arg1: memref<1x8x32xf32, #tpu.memory_space<vmem>>, %arg2: memref<1x8x32xf32, #tpu.memory_space<vmem>>, %arg3: memref<1x8x8xf32, #tpu.memory_space<vmem>>, %arg4: memref<1x8x8xf32, #tpu.memory_space<vmem>>, %arg5: memref<32x32xf32, #tpu.memory_space<vmem>>, %arg6: memref<32x32xf32, #tpu.memory_space<vmem>>, %arg7: memref<32x32xf32, #tpu.memory_space<vmem>>, %arg8: memref<32x32xf32, #tpu.memory_space<vmem>>, %arg9: memref<1x32xf32, #tpu.memory_space<vmem>>, %arg10: memref<1x32xf32, #tpu.memory_space<vmem>>, %arg11: memref<32x32xf32, #tpu.memory_space<vmem>>, %arg12: memref<32x32xf32, #tpu.memory_space<vmem>>, %arg13: memref<32x32xf32, #tpu.memory_space<vmem>>, %arg14: memref<32x32xf32, #tpu.memory_space<vmem>>, %arg15: memref<1x32xf32, #tpu.memory_space<vmem>>, %arg16: memref<1x32xf32, #tpu.memory_space<vmem>>, %arg17: memref<32x64xf32, #tpu.memory_space<vmem>>, %arg18: memref<1x64xf32, #tpu.memory_space<vmem>>, %arg19: memref<64x32xf32, #tpu.memory_space<vmem>>, %arg20: memref<1x32xf32, #tpu.memory_space<vmem>>, %arg21: memref<1x32xf32, #tpu.memory_space<vmem>>, %arg22: memref<1x32xf32, #tpu.memory_space<vmem>>, %arg23: memref<1x8x32xf32, #tpu.memory_space<vmem>>, %arg24: memref<1x4x8x8xf32, #tpu.memory_space<vmem>>, %arg25: memref<1x4x8x8xf32, #tpu.memory_space<vmem>>) attributes {dimension_semantics = [#tpu.dimension_semantics<parallel>], iteration_bounds = array<i64: 2>, scalar_prefetch = 0 : i64, scratch_operands = 0 : i64, tpu.core_type = #tpu.core_type<tc>, window_params = [{transform_indices = @transform_0, window_bounds = array<i64: 1, 8, 32>}, {transform_indices = @transform_1, window_bounds = array<i64: 1, 8, 32>}, {transform_indices = @transform_2, window_bounds = array<i64: 1, 8, 8>}, {transform_indices = @transform_3, window_bounds = array<i64: 1, 8, 8>}, {pipeline_mode = #tpu.pipeline_mode<synchronous>, transform_indices = @transform_4, window_bounds = array<i64: 32, 32>}, {pipeline_mode = #tpu.pipeline_mode<synchronous>, transform_indices = @transform_5, window_bounds = array<i64: 32, 32>}, {pipeline_mode = #tpu.pipeline_mode<synchronous>, transform_indices = @transform_6, window_bounds = array<i64: 32, 32>}, {pipeline_mode = #tpu.pipeline_mode<synchronous>, transform_indices = @transform_7, window_bounds = array<i64: 32, 32>}, {pipeline_mode = #tpu.pipeline_mode<synchronous>, transform_indices = @transform_8, window_bounds = array<i64: 1, 32>}, {pipeline_mode = #tpu.pipeline_mode<synchronous>, transform_indices = @transform_9, window_bounds = array<i64: 1, 32>}, {pipeline_mode = #tpu.pipeline_mode<synchronous>, transform_indices = @transform_10, window_bounds = array<i64: 32, 32>}, {pipeline_mode = #tpu.pipeline_mode<synchronous>, transform_indices = @transform_11, window_bounds = array<i64: 32, 32>}, {pipeline_mode = #tpu.pipeline_mode<synchronous>, transform_indices = @transform_12, window_bounds = array<i64: 32, 32>}, {pipeline_mode = #tpu.pipeline_mode<synchronous>, transform_indices = @transform_13, window_bounds = array<i64: 32, 32>}, {pipeline_mode = #tpu.pipeline_mode<synchronous>, transform_indices = @transform_14, window_bounds = array<i64: 1, 32>}, {pipeline_mode = #tpu.pipeline_mode<synchronous>, transform_indices = @transform_15, window_bounds = array<i64: 1, 32>}, {pipeline_mode = #tpu.pipeline_mode<synchronous>, transform_indices = @transform_16, window_bounds = array<i64: 32, 64>}, {pipeline_mode = #tpu.pipeline_mode<synchronous>, transform_indices = @transform_17, window_bounds = array<i64: 1, 64>}, {pipeline_mode = #tpu.pipeline_mode<synchronous>, transform_indices = @transform_18, window_bounds = array<i64: 64, 32>}, {pipeline_mode = #tpu.pipeline_mode<synchronous>, transform_indices = @transform_19, window_bounds = array<i64: 1, 32>}, {pipeline_mode = #tpu.pipeline_mode<synchronous>, transform_indices = @transform_20, window_bounds = array<i64: 1, 32>}, {pipeline_mode = #tpu.pipeline_mode<synchronous>, transform_indices = @transform_21, window_bounds = array<i64: 1, 32>}, {transform_indices = @transform_22, window_bounds = array<i64: 1, 8, 32>}, {transform_indices = @transform_23, window_bounds = array<i64: 1, 4, 8, 8>}, {transform_indices = @transform_24, window_bounds = array<i64: 1, 4, 8, 8>}]} {
    %c0 = arith.constant 0 : index
    %c0_0 = arith.constant 0 : index
    %c0_1 = arith.constant 0 : index
    %0 = vector.load %arg1[%c0, %c0_0, %c0_1] : memref<1x8x32xf32, #tpu.memory_space<vmem>>, vector<1x8x32xf32>
    %1 = vector.shape_cast %0 : vector<1x8x32xf32> to vector<8x32xf32>
    %c0_2 = arith.constant 0 : index
    %c0_3 = arith.constant 0 : index
    %c0_4 = arith.constant 0 : index
    %2 = vector.load %arg2[%c0_2, %c0_3, %c0_4] : memref<1x8x32xf32, #tpu.memory_space<vmem>>, vector<1x8x32xf32>
    %3 = vector.shape_cast %2 : vector<1x8x32xf32> to vector<8x32xf32>
    %c0_5 = arith.constant 0 : index
    %c0_6 = arith.constant 0 : index
    %c0_7 = arith.constant 0 : index
    %4 = vector.load %arg3[%c0_5, %c0_6, %c0_7] : memref<1x8x8xf32, #tpu.memory_space<vmem>>, vector<1x8x8xf32>
    %5 = vector.shape_cast %4 : vector<1x8x8xf32> to vector<8x8xf32>
    %c0_8 = arith.constant 0 : index
    %c0_9 = arith.constant 0 : index
    %c0_10 = arith.constant 0 : index
    %6 = vector.load %arg4[%c0_8, %c0_9, %c0_10] : memref<1x8x8xf32, #tpu.memory_space<vmem>>, vector<1x8x8xf32>
    %7 = vector.shape_cast %6 : vector<1x8x8xf32> to vector<8x8xf32>
    %c0_11 = arith.constant 0 : index
    %c0_12 = arith.constant 0 : index
    %8 = vector.load %arg5[%c0_11, %c0_12] : memref<32x32xf32, #tpu.memory_space<vmem>>, vector<32x32xf32>
    %c0_13 = arith.constant 0 : index
    %c0_14 = arith.constant 0 : index
    %9 = vector.load %arg6[%c0_13, %c0_14] : memref<32x32xf32, #tpu.memory_space<vmem>>, vector<32x32xf32>
    %c0_15 = arith.constant 0 : index
    %c0_16 = arith.constant 0 : index
    %10 = vector.load %arg7[%c0_15, %c0_16] : memref<32x32xf32, #tpu.memory_space<vmem>>, vector<32x32xf32>
    %c0_17 = arith.constant 0 : index
    %c0_18 = arith.constant 0 : index
    %11 = vector.load %arg8[%c0_17, %c0_18] : memref<32x32xf32, #tpu.memory_space<vmem>>, vector<32x32xf32>
    %c0_19 = arith.constant 0 : index
    %c0_20 = arith.constant 0 : index
    %12 = vector.load %arg9[%c0_19, %c0_20] : memref<1x32xf32, #tpu.memory_space<vmem>>, vector<1x32xf32>
    %c0_21 = arith.constant 0 : index
    %c0_22 = arith.constant 0 : index
    %13 = vector.load %arg10[%c0_21, %c0_22] : memref<1x32xf32, #tpu.memory_space<vmem>>, vector<1x32xf32>
    %cst = arith.constant dense<0.000000e+00> : vector<8x32xf32>
    %14 = tpu.matmul %1, %8, %cst {dimension_numbers = #tpu.dot_dimension_numbers<[1], [0], [0], [1], [0, 0, 1, 1], [], []>} : vector<8x32xf32>, vector<32x32xf32>, vector<8x32xf32> -> vector<8x32xf32>
    %cst_23 = arith.constant dense<0.000000e+00> : vector<8x32xf32>
    %15 = tpu.matmul %1, %9, %cst_23 {dimension_numbers = #tpu.dot_dimension_numbers<[1], [0], [0], [1], [0, 0, 1, 1], [], []>} : vector<8x32xf32>, vector<32x32xf32>, vector<8x32xf32> -> vector<8x32xf32>
    %cst_24 = arith.constant dense<0.000000e+00> : vector<8x32xf32>
    %16 = tpu.matmul %1, %10, %cst_24 {dimension_numbers = #tpu.dot_dimension_numbers<[1], [0], [0], [1], [0, 0, 1, 1], [], []>} : vector<8x32xf32>, vector<32x32xf32>, vector<8x32xf32> -> vector<8x32xf32>
    %cst_25 = arith.constant 0.353553385 : f32
    %17 = vector.broadcast %cst_25 : f32 to vector<8x32xf32>
    %18 = arith.mulf %14, %17 : vector<8x32xf32>
    %19 = tpu.transpose %18, [1, 0] : vector<8x32xf32> -> vector<32x8xf32>
    %20 = vector.shape_cast %19 : vector<32x8xf32> to vector<4x8x8xf32>
    %21 = tpu.transpose %15, [1, 0] : vector<8x32xf32> -> vector<32x8xf32>
    %22 = vector.shape_cast %21 : vector<32x8xf32> to vector<4x8x8xf32>
    %23 = tpu.transpose %16, [1, 0] : vector<8x32xf32> -> vector<32x8xf32>
    %24 = vector.shape_cast %23 : vector<32x8xf32> to vector<4x8x8xf32>
    %25 = tpu.transpose %20, [0, 2, 1] : vector<4x8x8xf32> -> vector<4x8x8xf32>
    "tpu.trace_start"() <{level = 10 : i32, message = "htd,hds->hts"}> : () -> ()
    %cst_26 = arith.constant dense<0.000000e+00> : vector<4x8x8xf32>
    %26 = tpu.matmul %25, %22, %cst_26 {dimension_numbers = #tpu.dot_dimension_numbers<[2], [1], [1], [2], [0, 0, 0, 1, 1, 2], [0], [0]>} : vector<4x8x8xf32>, vector<4x8x8xf32>, vector<4x8x8xf32> -> vector<4x8x8xf32>
    "tpu.trace_stop"() : () -> ()
    %27 = vector.shape_cast %5 : vector<8x8xf32> to vector<1x8x8xf32>
    %28 = vector.shape_cast %27 : vector<1x8x8xf32> to vector<1x8x8xf32>
    %29 = vector.broadcast %28 : vector<1x8x8xf32> to vector<4x8x8xf32>
    %cst_27 = arith.constant 0.000000e+00 : f32
    %30 = vector.broadcast %cst_27 : f32 to vector<4x8x8xf32>
    %31 = arith.cmpf oeq, %29, %30 : vector<4x8x8xf32>
    %cst_28 = arith.constant -1.000000e+09 : f32
    %32 = vector.broadcast %cst_28 : f32 to vector<4x8x8xf32>
    %33 = arith.select %31, %32, %26 : vector<4x8x8xi1>, vector<4x8x8xf32>
    %cst_29 = arith.constant dense<0xFF800000> : vector<4x8xf32>
    %34 = vector.multi_reduction <maximumf>, %33, %cst_29 [2] : vector<4x8x8xf32> to vector<4x8xf32>
    %35 = vector.shape_cast %34 : vector<4x8xf32> to vector<4x8x1xf32>
    %36 = vector.broadcast %35 : vector<4x8x1xf32> to vector<4x8x8xf32>
    %37 = arith.subf %33, %36 : vector<4x8x8xf32>
    %38 = math.exp %37 : vector<4x8x8xf32>
    %cst_30 = arith.constant dense<0.000000e+00> : vector<4x8xf32>
    %39 = vector.multi_reduction <add>, %38, %cst_30 [2] : vector<4x8x8xf32> to vector<4x8xf32>
    %40 = vector.shape_cast %39 : vector<4x8xf32> to vector<4x8x1xf32>
    %41 = vector.broadcast %40 : vector<4x8x1xf32> to vector<4x8x8xf32>
    %42 = arith.divf %38, %41 : vector<4x8x8xf32>
    "tpu.trace_start"() <{level = 10 : i32, message = "hts,hds->htd"}> : () -> ()
    %cst_31 = arith.constant dense<0.000000e+00> : vector<4x8x8xf32>
    %43 = tpu.matmul %42, %24, %cst_31 {dimension_numbers = #tpu.dot_dimension_numbers<[2], [2], [1], [1], [0, 0, 0, 1, 1, 1], [0], [0]>} : vector<4x8x8xf32>, vector<4x8x8xf32>, vector<4x8x8xf32> -> vector<4x8x8xf32>
    "tpu.trace_stop"() : () -> ()
    %44 = tpu.transpose %43, [0, 2, 1] : vector<4x8x8xf32> -> vector<4x8x8xf32>
    %45 = vector.shape_cast %44 : vector<4x8x8xf32> to vector<32x8xf32>
    %46 = tpu.transpose %45, [1, 0] : vector<32x8xf32> -> vector<8x32xf32>
    %cst_32 = arith.constant dense<0.000000e+00> : vector<8x32xf32>
    %47 = tpu.matmul %46, %11, %cst_32 {dimension_numbers = #tpu.dot_dimension_numbers<[1], [0], [0], [1], [0, 0, 1, 1], [], []>} : vector<8x32xf32>, vector<32x32xf32>, vector<8x32xf32> -> vector<8x32xf32>
    %48 = arith.addf %47, %1 : vector<8x32xf32>
    %cst_33 = arith.constant dense<0.000000e+00> : vector<8xf32>
    %49 = vector.multi_reduction <add>, %48, %cst_33 [1] : vector<8x32xf32> to vector<8xf32>
    %50 = vector.shape_cast %49 : vector<8xf32> to vector<8x1xf32>
    %cst_34 = arith.constant 3.200000e+01 : f32
    %51 = vector.broadcast %cst_34 : f32 to vector<8x1xf32>
    %52 = arith.divf %50, %51 : vector<8x1xf32>
    %53 = vector.broadcast %52 : vector<8x1xf32> to vector<8x32xf32>
    %54 = arith.subf %48, %53 : vector<8x32xf32>
    %55 = arith.mulf %54, %54 : vector<8x32xf32>
    %cst_35 = arith.constant dense<0.000000e+00> : vector<8xf32>
    %56 = vector.multi_reduction <add>, %55, %cst_35 [1] : vector<8x32xf32> to vector<8xf32>
    %57 = vector.shape_cast %56 : vector<8xf32> to vector<8x1xf32>
    %cst_36 = arith.constant 3.200000e+01 : f32
    %58 = vector.broadcast %cst_36 : f32 to vector<8x1xf32>
    %59 = arith.divf %57, %58 : vector<8x1xf32>
    %60 = vector.broadcast %52 : vector<8x1xf32> to vector<8x32xf32>
    %61 = arith.subf %48, %60 : vector<8x32xf32>
    %cst_37 = arith.constant 9.99999997E-7 : f32
    %62 = vector.broadcast %cst_37 : f32 to vector<8x1xf32>
    %63 = arith.addf %59, %62 : vector<8x1xf32>
    %64 = math.rsqrt %63 : vector<8x1xf32>
    %65 = vector.broadcast %64 : vector<8x1xf32> to vector<8x32xf32>
    %66 = arith.mulf %61, %65 : vector<8x32xf32>
    %67 = vector.broadcast %12 : vector<1x32xf32> to vector<8x32xf32>
    %68 = arith.mulf %66, %67 : vector<8x32xf32>
    %69 = vector.broadcast %13 : vector<1x32xf32> to vector<8x32xf32>
    %70 = arith.addf %68, %69 : vector<8x32xf32>
    %c0_38 = arith.constant 0 : index
    %c0_39 = arith.constant 0 : index
    %71 = vector.load %arg11[%c0_38, %c0_39] : memref<32x32xf32, #tpu.memory_space<vmem>>, vector<32x32xf32>
    %c0_40 = arith.constant 0 : index
    %c0_41 = arith.constant 0 : index
    %72 = vector.load %arg12[%c0_40, %c0_41] : memref<32x32xf32, #tpu.memory_space<vmem>>, vector<32x32xf32>
    %c0_42 = arith.constant 0 : index
    %c0_43 = arith.constant 0 : index
    %73 = vector.load %arg13[%c0_42, %c0_43] : memref<32x32xf32, #tpu.memory_space<vmem>>, vector<32x32xf32>
    %c0_44 = arith.constant 0 : index
    %c0_45 = arith.constant 0 : index
    %74 = vector.load %arg14[%c0_44, %c0_45] : memref<32x32xf32, #tpu.memory_space<vmem>>, vector<32x32xf32>
    %c0_46 = arith.constant 0 : index
    %c0_47 = arith.constant 0 : index
    %75 = vector.load %arg15[%c0_46, %c0_47] : memref<1x32xf32, #tpu.memory_space<vmem>>, vector<1x32xf32>
    %c0_48 = arith.constant 0 : index
    %c0_49 = arith.constant 0 : index
    %76 = vector.load %arg16[%c0_48, %c0_49] : memref<1x32xf32, #tpu.memory_space<vmem>>, vector<1x32xf32>
    %cst_50 = arith.constant dense<0.000000e+00> : vector<8x32xf32>
    %77 = tpu.matmul %70, %71, %cst_50 {dimension_numbers = #tpu.dot_dimension_numbers<[1], [0], [0], [1], [0, 0, 1, 1], [], []>} : vector<8x32xf32>, vector<32x32xf32>, vector<8x32xf32> -> vector<8x32xf32>
    %cst_51 = arith.constant dense<0.000000e+00> : vector<8x32xf32>
    %78 = tpu.matmul %3, %72, %cst_51 {dimension_numbers = #tpu.dot_dimension_numbers<[1], [0], [0], [1], [0, 0, 1, 1], [], []>} : vector<8x32xf32>, vector<32x32xf32>, vector<8x32xf32> -> vector<8x32xf32>
    %cst_52 = arith.constant dense<0.000000e+00> : vector<8x32xf32>
    %79 = tpu.matmul %3, %73, %cst_52 {dimension_numbers = #tpu.dot_dimension_numbers<[1], [0], [0], [1], [0, 0, 1, 1], [], []>} : vector<8x32xf32>, vector<32x32xf32>, vector<8x32xf32> -> vector<8x32xf32>
    %cst_53 = arith.constant 0.353553385 : f32
    %80 = vector.broadcast %cst_53 : f32 to vector<8x32xf32>
    %81 = arith.mulf %77, %80 : vector<8x32xf32>
    %82 = tpu.transpose %81, [1, 0] : vector<8x32xf32> -> vector<32x8xf32>
    %83 = vector.shape_cast %82 : vector<32x8xf32> to vector<4x8x8xf32>
    %84 = tpu.transpose %78, [1, 0] : vector<8x32xf32> -> vector<32x8xf32>
    %85 = vector.shape_cast %84 : vector<32x8xf32> to vector<4x8x8xf32>
    %86 = tpu.transpose %79, [1, 0] : vector<8x32xf32> -> vector<32x8xf32>
    %87 = vector.shape_cast %86 : vector<32x8xf32> to vector<4x8x8xf32>
    %88 = tpu.transpose %83, [0, 2, 1] : vector<4x8x8xf32> -> vector<4x8x8xf32>
    "tpu.trace_start"() <{level = 10 : i32, message = "htd,hds->hts"}> : () -> ()
    %cst_54 = arith.constant dense<0.000000e+00> : vector<4x8x8xf32>
    %89 = tpu.matmul %88, %85, %cst_54 {dimension_numbers = #tpu.dot_dimension_numbers<[2], [1], [1], [2], [0, 0, 0, 1, 1, 2], [0], [0]>} : vector<4x8x8xf32>, vector<4x8x8xf32>, vector<4x8x8xf32> -> vector<4x8x8xf32>
    "tpu.trace_stop"() : () -> ()
    %90 = vector.shape_cast %7 : vector<8x8xf32> to vector<1x8x8xf32>
    %91 = vector.shape_cast %90 : vector<1x8x8xf32> to vector<1x8x8xf32>
    %92 = vector.broadcast %91 : vector<1x8x8xf32> to vector<4x8x8xf32>
    %cst_55 = arith.constant 0.000000e+00 : f32
    %93 = vector.broadcast %cst_55 : f32 to vector<4x8x8xf32>
    %94 = arith.cmpf oeq, %92, %93 : vector<4x8x8xf32>
    %cst_56 = arith.constant -1.000000e+09 : f32
    %95 = vector.broadcast %cst_56 : f32 to vector<4x8x8xf32>
    %96 = arith.select %94, %95, %89 : vector<4x8x8xi1>, vector<4x8x8xf32>
    %cst_57 = arith.constant dense<0xFF800000> : vector<4x8xf32>
    %97 = vector.multi_reduction <maximumf>, %96, %cst_57 [2] : vector<4x8x8xf32> to vector<4x8xf32>
    %98 = vector.shape_cast %97 : vector<4x8xf32> to vector<4x8x1xf32>
    %99 = vector.broadcast %98 : vector<4x8x1xf32> to vector<4x8x8xf32>
    %100 = arith.subf %96, %99 : vector<4x8x8xf32>
    %101 = math.exp %100 : vector<4x8x8xf32>
    %cst_58 = arith.constant dense<0.000000e+00> : vector<4x8xf32>
    %102 = vector.multi_reduction <add>, %101, %cst_58 [2] : vector<4x8x8xf32> to vector<4x8xf32>
    %103 = vector.shape_cast %102 : vector<4x8xf32> to vector<4x8x1xf32>
    %104 = vector.broadcast %103 : vector<4x8x1xf32> to vector<4x8x8xf32>
    %105 = arith.divf %101, %104 : vector<4x8x8xf32>
    "tpu.trace_start"() <{level = 10 : i32, message = "hts,hds->htd"}> : () -> ()
    %cst_59 = arith.constant dense<0.000000e+00> : vector<4x8x8xf32>
    %106 = tpu.matmul %105, %87, %cst_59 {dimension_numbers = #tpu.dot_dimension_numbers<[2], [2], [1], [1], [0, 0, 0, 1, 1, 1], [0], [0]>} : vector<4x8x8xf32>, vector<4x8x8xf32>, vector<4x8x8xf32> -> vector<4x8x8xf32>
    "tpu.trace_stop"() : () -> ()
    %107 = tpu.transpose %106, [0, 2, 1] : vector<4x8x8xf32> -> vector<4x8x8xf32>
    %108 = vector.shape_cast %107 : vector<4x8x8xf32> to vector<32x8xf32>
    %109 = tpu.transpose %108, [1, 0] : vector<32x8xf32> -> vector<8x32xf32>
    %cst_60 = arith.constant dense<0.000000e+00> : vector<8x32xf32>
    %110 = tpu.matmul %109, %74, %cst_60 {dimension_numbers = #tpu.dot_dimension_numbers<[1], [0], [0], [1], [0, 0, 1, 1], [], []>} : vector<8x32xf32>, vector<32x32xf32>, vector<8x32xf32> -> vector<8x32xf32>
    %111 = arith.addf %110, %70 : vector<8x32xf32>
    %cst_61 = arith.constant dense<0.000000e+00> : vector<8xf32>
    %112 = vector.multi_reduction <add>, %111, %cst_61 [1] : vector<8x32xf32> to vector<8xf32>
    %113 = vector.shape_cast %112 : vector<8xf32> to vector<8x1xf32>
    %cst_62 = arith.constant 3.200000e+01 : f32
    %114 = vector.broadcast %cst_62 : f32 to vector<8x1xf32>
    %115 = arith.divf %113, %114 : vector<8x1xf32>
    %116 = vector.broadcast %115 : vector<8x1xf32> to vector<8x32xf32>
    %117 = arith.subf %111, %116 : vector<8x32xf32>
    %118 = arith.mulf %117, %117 : vector<8x32xf32>
    %cst_63 = arith.constant dense<0.000000e+00> : vector<8xf32>
    %119 = vector.multi_reduction <add>, %118, %cst_63 [1] : vector<8x32xf32> to vector<8xf32>
    %120 = vector.shape_cast %119 : vector<8xf32> to vector<8x1xf32>
    %cst_64 = arith.constant 3.200000e+01 : f32
    %121 = vector.broadcast %cst_64 : f32 to vector<8x1xf32>
    %122 = arith.divf %120, %121 : vector<8x1xf32>
    %123 = vector.broadcast %115 : vector<8x1xf32> to vector<8x32xf32>
    %124 = arith.subf %111, %123 : vector<8x32xf32>
    %cst_65 = arith.constant 9.99999997E-7 : f32
    %125 = vector.broadcast %cst_65 : f32 to vector<8x1xf32>
    %126 = arith.addf %122, %125 : vector<8x1xf32>
    %127 = math.rsqrt %126 : vector<8x1xf32>
    %128 = vector.broadcast %127 : vector<8x1xf32> to vector<8x32xf32>
    %129 = arith.mulf %124, %128 : vector<8x32xf32>
    %130 = vector.broadcast %75 : vector<1x32xf32> to vector<8x32xf32>
    %131 = arith.mulf %129, %130 : vector<8x32xf32>
    %132 = vector.broadcast %76 : vector<1x32xf32> to vector<8x32xf32>
    %133 = arith.addf %131, %132 : vector<8x32xf32>
    %c0_66 = arith.constant 0 : index
    %c0_67 = arith.constant 0 : index
    %134 = vector.load %arg17[%c0_66, %c0_67] : memref<32x64xf32, #tpu.memory_space<vmem>>, vector<32x64xf32>
    %cst_68 = arith.constant dense<0.000000e+00> : vector<8x64xf32>
    %135 = tpu.matmul %133, %134, %cst_68 {dimension_numbers = #tpu.dot_dimension_numbers<[1], [0], [0], [1], [0, 0, 1, 1], [], []>} : vector<8x32xf32>, vector<32x64xf32>, vector<8x64xf32> -> vector<8x64xf32>
    %c0_69 = arith.constant 0 : index
    %c0_70 = arith.constant 0 : index
    %136 = vector.load %arg18[%c0_69, %c0_70] : memref<1x64xf32, #tpu.memory_space<vmem>>, vector<1x64xf32>
    %137 = vector.broadcast %136 : vector<1x64xf32> to vector<8x64xf32>
    %138 = arith.addf %135, %137 : vector<8x64xf32>
    %cst_71 = arith.constant 0.000000e+00 : f32
    %139 = vector.broadcast %cst_71 : f32 to vector<8x64xf32>
    %140 = arith.maximumf %138, %139 : vector<8x64xf32>
    %c0_72 = arith.constant 0 : index
    %c0_73 = arith.constant 0 : index
    %141 = vector.load %arg19[%c0_72, %c0_73] : memref<64x32xf32, #tpu.memory_space<vmem>>, vector<64x32xf32>
    %cst_74 = arith.constant dense<0.000000e+00> : vector<8x32xf32>
    %142 = tpu.matmul %140, %141, %cst_74 {dimension_numbers = #tpu.dot_dimension_numbers<[1], [0], [0], [1], [0, 0, 1, 1], [], []>} : vector<8x64xf32>, vector<64x32xf32>, vector<8x32xf32> -> vector<8x32xf32>
    %c0_75 = arith.constant 0 : index
    %c0_76 = arith.constant 0 : index
    %143 = vector.load %arg20[%c0_75, %c0_76] : memref<1x32xf32, #tpu.memory_space<vmem>>, vector<1x32xf32>
    %144 = vector.broadcast %143 : vector<1x32xf32> to vector<8x32xf32>
    %145 = arith.addf %142, %144 : vector<8x32xf32>
    %146 = arith.addf %145, %133 : vector<8x32xf32>
    %c0_77 = arith.constant 0 : index
    %c0_78 = arith.constant 0 : index
    %147 = vector.load %arg21[%c0_77, %c0_78] : memref<1x32xf32, #tpu.memory_space<vmem>>, vector<1x32xf32>
    %c0_79 = arith.constant 0 : index
    %c0_80 = arith.constant 0 : index
    %148 = vector.load %arg22[%c0_79, %c0_80] : memref<1x32xf32, #tpu.memory_space<vmem>>, vector<1x32xf32>
    %cst_81 = arith.constant dense<0.000000e+00> : vector<8xf32>
    %149 = vector.multi_reduction <add>, %146, %cst_81 [1] : vector<8x32xf32> to vector<8xf32>
    %150 = vector.shape_cast %149 : vector<8xf32> to vector<8x1xf32>
    %cst_82 = arith.constant 3.200000e+01 : f32
    %151 = vector.broadcast %cst_82 : f32 to vector<8x1xf32>
    %152 = arith.divf %150, %151 : vector<8x1xf32>
    %153 = vector.broadcast %152 : vector<8x1xf32> to vector<8x32xf32>
    %154 = arith.subf %146, %153 : vector<8x32xf32>
    %155 = arith.mulf %154, %154 : vector<8x32xf32>
    %cst_83 = arith.constant dense<0.000000e+00> : vector<8xf32>
    %156 = vector.multi_reduction <add>, %155, %cst_83 [1] : vector<8x32xf32> to vector<8xf32>
    %157 = vector.shape_cast %156 : vector<8xf32> to vector<8x1xf32>
    %cst_84 = arith.constant 3.200000e+01 : f32
    %158 = vector.broadcast %cst_84 : f32 to vector<8x1xf32>
    %159 = arith.divf %157, %158 : vector<8x1xf32>
    %160 = vector.broadcast %152 : vector<8x1xf32> to vector<8x32xf32>
    %161 = arith.subf %146, %160 : vector<8x32xf32>
    %cst_85 = arith.constant 9.99999997E-7 : f32
    %162 = vector.broadcast %cst_85 : f32 to vector<8x1xf32>
    %163 = arith.addf %159, %162 : vector<8x1xf32>
    %164 = math.rsqrt %163 : vector<8x1xf32>
    %165 = vector.broadcast %164 : vector<8x1xf32> to vector<8x32xf32>
    %166 = arith.mulf %161, %165 : vector<8x32xf32>
    %167 = vector.broadcast %147 : vector<1x32xf32> to vector<8x32xf32>
    %168 = arith.mulf %166, %167 : vector<8x32xf32>
    %169 = vector.broadcast %148 : vector<1x32xf32> to vector<8x32xf32>
    %170 = arith.addf %168, %169 : vector<8x32xf32>
    %c0_86 = arith.constant 0 : index
    %c0_87 = arith.constant 0 : index
    %c0_88 = arith.constant 0 : index
    %171 = vector.load %arg23[%c0_86, %c0_87, %c0_88] : memref<1x8x32xf32, #tpu.memory_space<vmem>>, vector<1x8x32xf32>
    %172 = vector.shape_cast %171 : vector<1x8x32xf32> to vector<8x32xf32>
    %173 = vector.shape_cast %170 : vector<8x32xf32> to vector<1x8x32xf32>
    tpu.vector_store %arg23[%c0_86, %c0_87, %c0_88], %173 {strides = array<i32>} : memref<1x8x32xf32, #tpu.memory_space<vmem>>, vector<1x8x32xf32>,
    %c0_89 = arith.constant 0 : index
    %c0_90 = arith.constant 0 : index
    %c0_91 = arith.constant 0 : index
    %c0_92 = arith.constant 0 : index
    %174 = vector.load %arg24[%c0_89, %c0_90, %c0_91, %c0_92] : memref<1x4x8x8xf32, #tpu.memory_space<vmem>>, vector<1x4x8x8xf32>
    %175 = vector.shape_cast %174 : vector<1x4x8x8xf32> to vector<4x8x8xf32>
    %176 = vector.shape_cast %42 : vector<4x8x8xf32> to vector<1x4x8x8xf32>
    tpu.vector_store %arg24[%c0_89, %c0_90, %c0_91, %c0_92], %176 {strides = array<i32>} : memref<1x4x8x8xf32, #tpu.memory_space<vmem>>, vector<1x4x8x8xf32>,
    %c0_93 = arith.constant 0 : index
    %c0_94 = arith.constant 0 : index
    %c0_95 = arith.constant 0 : index
    %c0_96 = arith.constant 0 : index
    %177 = vector.load %arg25[%c0_93, %c0_94, %c0_95, %c0_96] : memref<1x4x8x8xf32, #tpu.memory_space<vmem>>, vector<1x4x8x8xf32>
    %178 = vector.shape_cast %177 : vector<1x4x8x8xf32> to vector<4x8x8xf32>
    %179 = vector.shape_cast %105 : vector<4x8x8xf32> to vector<1x4x8x8xf32>
    tpu.vector_store %arg25[%c0_93, %c0_94, %c0_95, %c0_96], %179 {strides = array<i32>} : memref<1x4x8x8xf32, #tpu.memory_space<vmem>>, vector<1x4x8x8xf32>,
    return
  }
  func.func @transform_0(%arg0: i32) -> (i32, i32, i32) {
    %c0_i32 = arith.constant 0 : i32
    %c0_i32_0 = arith.constant 0 : i32
    %c0_i32_1 = arith.constant 0 : i32
    return %arg0, %c0_i32, %c0_i32_0 : i32, i32, i32
  }
  func.func @transform_1(%arg0: i32) -> (i32, i32, i32) {
    %c0_i32 = arith.constant 0 : i32
    %c0_i32_0 = arith.constant 0 : i32
    %c0_i32_1 = arith.constant 0 : i32
    return %arg0, %c0_i32, %c0_i32_0 : i32, i32, i32
  }
  func.func @transform_2(%arg0: i32) -> (i32, i32, i32) {
    %c0_i32 = arith.constant 0 : i32
    %c0_i32_0 = arith.constant 0 : i32
    %c0_i32_1 = arith.constant 0 : i32
    return %arg0, %c0_i32, %c0_i32_0 : i32, i32, i32
  }
  func.func @transform_3(%arg0: i32) -> (i32, i32, i32) {
    %c0_i32 = arith.constant 0 : i32
    %c0_i32_0 = arith.constant 0 : i32
    %c0_i32_1 = arith.constant 0 : i32
    return %arg0, %c0_i32, %c0_i32_0 : i32, i32, i32
  }
  func.func @transform_4(%arg0: i32) -> (i32, i32) {
    %c0_i32 = arith.constant 0 : i32
    %c0_i32_0 = arith.constant 0 : i32
    %c0_i32_1 = arith.constant 0 : i32
    return %c0_i32, %c0_i32_0 : i32, i32
  }
  func.func @transform_5(%arg0: i32) -> (i32, i32) {
    %c0_i32 = arith.constant 0 : i32
    %c0_i32_0 = arith.constant 0 : i32
    %c0_i32_1 = arith.constant 0 : i32
    return %c0_i32, %c0_i32_0 : i32, i32
  }
  func.func @transform_6(%arg0: i32) -> (i32, i32) {
    %c0_i32 = arith.constant 0 : i32
    %c0_i32_0 = arith.constant 0 : i32
    %c0_i32_1 = arith.constant 0 : i32
    return %c0_i32, %c0_i32_0 : i32, i32
  }
  func.func @transform_7(%arg0: i32) -> (i32, i32) {
    %c0_i32 = arith.constant 0 : i32
    %c0_i32_0 = arith.constant 0 : i32
    %c0_i32_1 = arith.constant 0 : i32
    return %c0_i32, %c0_i32_0 : i32, i32
  }
  func.func @transform_8(%arg0: i32) -> (i32, i32) {
    %c0_i32 = arith.constant 0 : i32
    %c0_i32_0 = arith.constant 0 : i32
    %c0_i32_1 = arith.constant 0 : i32
    return %c0_i32, %c0_i32_0 : i32, i32
  }
  func.func @transform_9(%arg0: i32) -> (i32, i32) {
    %c0_i32 = arith.constant 0 : i32
    %c0_i32_0 = arith.constant 0 : i32
    %c0_i32_1 = arith.constant 0 : i32
    return %c0_i32, %c0_i32_0 : i32, i32
  }
  func.func @transform_10(%arg0: i32) -> (i32, i32) {
    %c0_i32 = arith.constant 0 : i32
    %c0_i32_0 = arith.constant 0 : i32
    %c0_i32_1 = arith.constant 0 : i32
    return %c0_i32, %c0_i32_0 : i32, i32
  }
  func.func @transform_11(%arg0: i32) -> (i32, i32) {
    %c0_i32 = arith.constant 0 : i32
    %c0_i32_0 = arith.constant 0 : i32
    %c0_i32_1 = arith.constant 0 : i32
    return %c0_i32, %c0_i32_0 : i32, i32
  }
  func.func @transform_12(%arg0: i32) -> (i32, i32) {
    %c0_i32 = arith.constant 0 : i32
    %c0_i32_0 = arith.constant 0 : i32
    %c0_i32_1 = arith.constant 0 : i32
    return %c0_i32, %c0_i32_0 : i32, i32
  }
  func.func @transform_13(%arg0: i32) -> (i32, i32) {
    %c0_i32 = arith.constant 0 : i32
    %c0_i32_0 = arith.constant 0 : i32
    %c0_i32_1 = arith.constant 0 : i32
    return %c0_i32, %c0_i32_0 : i32, i32
  }
  func.func @transform_14(%arg0: i32) -> (i32, i32) {
    %c0_i32 = arith.constant 0 : i32
    %c0_i32_0 = arith.constant 0 : i32
    %c0_i32_1 = arith.constant 0 : i32
    return %c0_i32, %c0_i32_0 : i32, i32
  }
  func.func @transform_15(%arg0: i32) -> (i32, i32) {
    %c0_i32 = arith.constant 0 : i32
    %c0_i32_0 = arith.constant 0 : i32
    %c0_i32_1 = arith.constant 0 : i32
    return %c0_i32, %c0_i32_0 : i32, i32
  }
  func.func @transform_16(%arg0: i32) -> (i32, i32) {
    %c0_i32 = arith.constant 0 : i32
    %c0_i32_0 = arith.constant 0 : i32
    %c0_i32_1 = arith.constant 0 : i32
    return %c0_i32, %c0_i32_0 : i32, i32
  }
  func.func @transform_17(%arg0: i32) -> (i32, i32) {
    %c0_i32 = arith.constant 0 : i32
    %c0_i32_0 = arith.constant 0 : i32
    %c0_i32_1 = arith.constant 0 : i32
    return %c0_i32, %c0_i32_0 : i32, i32
  }
  func.func @transform_18(%arg0: i32) -> (i32, i32) {
    %c0_i32 = arith.constant 0 : i32
    %c0_i32_0 = arith.constant 0 : i32
    %c0_i32_1 = arith.constant 0 : i32
    return %c0_i32, %c0_i32_0 : i32, i32
  }
  func.func @transform_19(%arg0: i32) -> (i32, i32) {
    %c0_i32 = arith.constant 0 : i32
    %c0_i32_0 = arith.constant 0 : i32
    %c0_i32_1 = arith.constant 0 : i32
    return %c0_i32, %c0_i32_0 : i32, i32
  }
  func.func @transform_20(%arg0: i32) -> (i32, i32) {
    %c0_i32 = arith.constant 0 : i32
    %c0_i32_0 = arith.constant 0 : i32
    %c0_i32_1 = arith.constant 0 : i32
    return %c0_i32, %c0_i32_0 : i32, i32
  }
  func.func @transform_21(%arg0: i32) -> (i32, i32) {
    %c0_i32 = arith.constant 0 : i32
    %c0_i32_0 = arith.constant 0 : i32
    %c0_i32_1 = arith.constant 0 : i32
    return %c0_i32, %c0_i32_0 : i32, i32
  }
  func.func @transform_22(%arg0: i32) -> (i32, i32, i32) {
    %c0_i32 = arith.constant 0 : i32
    %c0_i32_0 = arith.constant 0 : i32
    %c0_i32_1 = arith.constant 0 : i32
    return %arg0, %c0_i32, %c0_i32_0 : i32, i32, i32
  }
  func.func @transform_23(%arg0: i32) -> (i32, i32, i32, i32) {
    %c0_i32 = arith.constant 0 : i32
    %c0_i32_0 = arith.constant 0 : i32
    %c0_i32_1 = arith.constant 0 : i32
    %c0_i32_2 = arith.constant 0 : i32
    return %arg0, %c0_i32, %c0_i32_0, %c0_i32_1 : i32, i32, i32, i32
  }
  func.func @transform_24(%arg0: i32) -> (i32, i32, i32, i32) {
    %c0_i32 = arith.constant 0 : i32
    %c0_i32_0 = arith.constant 0 : i32
    %c0_i32_1 = arith.constant 0 : i32
    %c0_i32_2 = arith.constant 0 : i32
    return %arg0, %c0_i32, %c0_i32_0, %c0_i32_1 : i32, i32, i32, i32
  }
}

</mosaic_0001>

<bundles_post_ra>
// kernel: tpu_custom_call.1
= control target key start
LH: loop header
LB: loop body
LE: loop exit
PB: predicated region body
PF: predicated region fallthrough
CT: control target
= control target key end

     0   :  { %s6385_s0 = inlined_call_operand.hbm [shape: f32[2,8,32], index: 0, kind: input, shape index: {}]   ;;  %s6386_s1 = inlined_call_operand.hbm [shape: f32[2,8,32], index: 1, kind: input, shape index: {}]   ;;  %s6387_s2 = inlined_call_operand.hbm [shape: f32[2,8,8], index: 2, kind: input, shape index: {}]   ;;  %s6388_s3 = inlined_call_operand.hbm [shape: f32[2,8,8], index: 3, kind: input, shape index: {}]   ;;  %s6389_s4 = inlined_call_operand.vmem [shape: f32[32,32], index: 4, kind: input, shape index: {}]   ;;  %s6390_s5 = inlined_call_operand.vmem [shape: f32[32,32], index: 5, kind: input, shape index: {}]   ;;  %s6391_s6 = inlined_call_operand.vmem [shape: f32[32,32], index: 6, kind: input, shape index: {}]   ;;  %s6392_s7 = inlined_call_operand.hbm [shape: f32[32,32], index: 7, kind: input, shape index: {}]   ;;  %s6393_s8 = inlined_call_operand.hbm [shape: f32[1,32], index: 8, kind: input, shape index: {}]   ;;  %s6394_s9 = inlined_call_operand.hbm [shape: f32[1,32], index: 9, kind: input, shape index: {}]   ;;  %s6395_s10 = inlined_call_operand.hbm [shape: f32[32,32], index: 10, kind: input, shape index: {}]   ;;  %s6396_s11 = inlined_call_operand.hbm [shape: f32[32,32], index: 11, kind: input, shape index: {}]   ;;  %s6397_s12 = inlined_call_operand.hbm [shape: f32[32,32], index: 12, kind: input, shape index: {}]   ;;  %s6398_s13 = inlined_call_operand.hbm [shape: f32[32,32], index: 13, kind: input, shape index: {}]   ;;  %s6399_s14 = inlined_call_operand.hbm [shape: f32[1,32], index: 14, kind: input, shape index: {}]   ;;  %s6400_s15 = inlined_call_operand.hbm [shape: f32[1,32], index: 15, kind: input, shape index: {}]   ;;  %s6401_s16 = inlined_call_operand.hbm [shape: f32[32,64], index: 16, kind: input, shape index: {}]   ;;  %s6402_s17 = inlined_call_operand.hbm [shape: f32[1,64], index: 17, kind: input, shape index: {}]   ;;  %s6403_s18 = inlined_call_operand.vmem [shape: f32[64,32], index: 18, kind: input, shape index: {}]   ;;  %s6404_s19 = inlined_call_operand.vmem [shape: f32[1,32], index: 19, kind: input, shape index: {}]   ;;  %s6405_s20 = inlined_call_operand.vmem [shape: f32[1,32], index: 20, kind: input, shape index: {}]   ;;  %s6406_s21 = inlined_call_operand.vmem [shape: f32[1,32], index: 21, kind: input, shape index: {}]   ;;  %s6407_s22 = inlined_call_operand.hbm [shape: f32[2,8,32], index: 22, kind: output, shape index: {0}]   ;;  %s6408_s23 = inlined_call_operand.hbm [shape: f32[2,4,8,8], index: 23, kind: output, shape index: {1}]   ;;  %s6409_s24 = inlined_call_operand.hbm [shape: f32[2,4,8,8], index: 24, kind: output, shape index: {2}]  }
   0x1   :  { %6452 = sst [smem:[#allocation46_spill]] %s6385_s0 }
   0x2   :  { %6453 = sst [smem:[#allocation47_spill]] %s6386_s1 }
   0x3   :  { %6454 = sst [smem:[#allocation48_spill]] %s6387_s2 }
   0x4   :  { %6455 = sst [smem:[#allocation49_spill]] %s6388_s3 }
   0x5   :  { %6456 = sst [smem:[#allocation50_spill]] %s6389_s4 }
   0x6   :  { %6457 = sst [smem:[#allocation51_spill]] %s6390_s5 }
   0x7   :  { %6458 = sst [smem:[#allocation52_spill]] %s6391_s6 }
   0x8   :  { %6459 = sst [smem:[#allocation53_spill]] %s6392_s7 }
   0x9   :  { %6460 = sst [smem:[#allocation54_spill]] %s6393_s8 }
   0xa   :  { %6461 = sst [smem:[#allocation55_spill]] %s6394_s9 }
   0xb   :  { %6462 = sst [smem:[#allocation56_spill]] %s6395_s10 }
   0xc   :  { %6463 = sst [smem:[#allocation57_spill]] %s6396_s11 }
   0xd   :  { %6464 = sst [smem:[#allocation58_spill]] %s6397_s12 }
   0xe   :  { %6465 = sst [smem:[#allocation59_spill]] %s6399_s14 }
   0xf   :  { %6466 = sst [smem:[#allocation60_spill]] %s6401_s16 }
  0x10   :  { %6467 = sst [smem:[#allocation61_spill]] %s6403_s18 }
  0x11   :  { %6468 = sst [smem:[#allocation62_spill]] %s6404_s19 }
  0x12   :  { %6469 = sst [smem:[#allocation63_spill]] %s6405_s20 }
  0x13   :  { %6470 = sst [smem:[#allocation64_spill]] %s6406_s21 }
  0x14   :  { %6471 = sst [smem:[#allocation65_spill]] %s6407_s22 }
  0x15   :  { %6472 = sst [smem:[#allocation66_spill]] %s6408_s23 }
  0x16   :  { %6473 = sst [smem:[#allocation67_spill]] %s6409_s24 }
  0x17   :  { %30 = vsyncpa [#allocation3], 0 }
  0x18   :  { %32 = vsyncpa [#allocation3 + $0x1], 0 }
  0x19   :  { %33 = vsyncpa [#allocation6], 0 }
  0x1a   :  { %35 = vsyncpa [#allocation6 + $0x1], 0 }
  0x1b   :  { %36 = vsyncpa [#allocation9], 0 }
  0x1c   :  { %38 = vsyncpa [#allocation9 + $0x1], 0 }
  0x1d   :  { %39 = vsyncpa [#allocation12], 0 }
  0x1e   :  { %40 = vsyncpa [#allocation15], 0 }
  0x1f   :  { %41 = vsyncpa [#allocation18], 0 }
  0x20   :  { %42 = vsyncpa [#allocation21], 0 }
  0x21   :  { %43 = vsyncpa [#allocation24], 0 }
  0x22   :  { %44 = vsyncpa [#allocation4], 0 }
  0x23   :  { %46 = vsyncpa [#allocation4 + $0x1], 0 }
  0x24   :  { %47 = vsyncpa [#allocation28], 0 }
  0x25   :  { %49 = vsyncpa [#allocation28 + $0x1], 0  ;;  %s5636_s5 = smov 0   ;;  %s5638_s26 = smov 0  }
  0x26   :  { %s5640_s27 = smov 0   ;;  %s5642_s28 = smov 0  }
  0x27 LB: > { %6474 = sst [smem:[#allocation41_spill]] %s5473_s5  ;;  %s5487_s6 = smov [#allocation10]   ;;  %s5485_s28 = sphi %s5642_s28, %s6541_s28   ;;  %s5481_s27 = sphi %s5640_s27, %s6545_s27   ;;  %s5477_s26 = sphi %s5638_s26, %s6544_s26   ;;  %s5473_s5 = sphi %s5636_s5, %s6543_s5  }
  0x28   : > { %s641_s2 = sshll.u32 %s5487_s6, 4  ;;  %s5657_s29 = sadd.s32 4294967295, %s5485_s28   ;;  %s642_s2 = int_to_ptr.vmem [resolvable:$true] %s641_s2 }
  0x29   : > { %p4331_p0 = scmp.ge.s32.totalorder %s5485_s28, 1  ;;  %p6430_p1 = scmp.eq.s32.totalorder %s5657_s29, 0 }
  0x2a   : > { %p620_p2 = scmp.lt.s32.totalorder %s5485_s28, 3  ;;  %s5488_s7 = smov [#allocation11]  }
  0x2b   : > { %s655_s30 = sshll.u32 %s5488_s7, 4  ;;  %s5489_s25 = smov [#allocation14]   ;;  %s656_s30 = int_to_ptr.vmem [resolvable:$true] %s655_s30 }
  0x2c   : > { %p5662_p3 = pnand %p4331_p0, %p620_p2  ;;  %s676_s8 = sshll.u32 %s5489_s25, 4  ;;  %s5675_s8 = int_to_ptr.vmem [resolvable:$true] %s676_s8 }
  0x2d   : > { %s4946_s1 = scalar_lea.vmem %s642_s2, 512  ;;  %p4954_p11 = scmp.lt.s32.totalorder %s642_s2, %s642_s2 }
  0x2e   : > { %s6475_s0 = scalar_select %p5662_p3, 1, 0 }
  0x2f   : > { %p4767_p5 = pneg %p5662_p3  ;;  %p4947_p8 = scmp.ne.s32.totalorder %s642_s2, %s4946_s1 }
  0x30   : > { %p4955_p12 = scmp.lt.s32.totalorder %s4946_s1, %s4946_s1 }
  0x31   : > { %p5671_p6 = pnand %p4767_p5, %p6430_p1 }
  0x32   : > { %p4956_p13 = por %p4955_p12, %p4954_p11 }
  0x33   : > { %s6476_s3 = scalar_select %p5671_p6, 1, 0 }
  0x34   : > { %p5679_p7 = pneg %p5671_p6 }
  0x36   : > { %s6477_s4 = scalar_select %p5679_p7, 1, 0 }
  0x37   : > { %p4949_p9 = pnand %p4947_p8, %p5679_p7 }
  0x39   : > { %p4950_p10 = pneg %p4949_p9 }
  0x3b   : > { %p4957_p0 = pnand %p4956_p13, %p4950_p10 }
  0x3d   : > { %4960 = shalt.err (!%p4957_p0)
}
  0x3e   : > { %s6422_s6 = smov 128   ;;  %s6424_s7 = smov 8  }
  0x3f   : > { %s6478_s21 = sld [smem:[#allocation53_spill]]  ;;  %s4972_s20 = scalar_lea.vmem %s656_s30, 16 }
  0x40   : > { %p4973_p2 = scmp.ne.s32.totalorder %s656_s30, %s4972_s20  ;;  %s4979_s1 = scalar_lea.vmem %s656_s30, 32 }
  0x41   : > { %p4980_p9 = scmp.lt.s32.totalorder %s656_s30, %s656_s30  ;;  %p4981_p10 = scmp.lt.s32.totalorder %s4979_s1, %s4972_s20 }
  0x42   : > { %p4975_p5 = pnand %p4973_p2, %p5679_p7 }
  0x43   : > { %p4982_p11 = por %p4981_p10, %p4980_p9 }
  0x44   : > { %p4976_p8 = pneg %p4975_p5 }
  0x45   : > { %4770 = dma.hbm_to_vmem [thread:$0]  (!%p5671_p6), %s6478_s21, 512, %s642_s2, [#allocation9], %s6422_s6, %s6422_s6, %s6424_s7  }
  0x46   : > { %p4983_p12 = pnand %p4982_p11, %p4976_p8 }
  0x48   : > { %4986 = shalt.err (!%p4983_p12)
}
  0x49   : > { %s6479_s19 = sld [smem:[#allocation54_spill]]  ;;  %s4998_s21 = scalar_lea.vmem %s5675_s8, 512 }
  0x4a   : > { %p4999_p13 = scmp.ne.s32.totalorder %s5675_s8, %s4998_s21  ;;  %p5006_p5 = scmp.lt.s32.totalorder %s5675_s8, %s5675_s8 }
  0x4b   : > { %p5007_p9 = scmp.lt.s32.totalorder %s4998_s21, %s4998_s21 }
  0x4c   : > { %p5001_p0 = pnand %p4999_p13, %p5679_p7 }
  0x4d   : > { %p5008_p8 = por %p5007_p9, %p5006_p5 }
  0x4e   : > { %p5002_p2 = pneg %p5001_p0 }
  0x4f   : > { %4773 = dma.hbm_to_vmem [thread:$0]  (!%p5671_p6), %s6479_s19, 16, %s656_s30, [#allocation12]  }
  0x50   : > { %p5009_p10 = pnand %p5008_p8, %p5002_p2 }
  0x52   : > { %5012 = shalt.err (!%p5009_p10)
}
  0x53   : > { %s6480_s10 = sld [smem:[#allocation56_spill]]  ;;  %s5492_s19 = smov [#allocation17]  }
  0x54   : > { %s702_s23 = sshll.u32 %s5492_s19, 4  ;;  %s5493_s24 = smov [#allocation20]   ;;  %s703_s23 = int_to_ptr.vmem [resolvable:$true] %s702_s23 }
  0x55   : > { %s729_s2 = sshll.u32 %s5493_s24, 4  ;;  %s5024_s30 = scalar_lea.vmem %s703_s23, 512  ;;  %s730_s2 = int_to_ptr.vmem [resolvable:$true] %s729_s2 }
  0x56   : > { %p5025_p11 = scmp.ne.s32.totalorder %s703_s23, %s5024_s30  ;;  %p5032_p0 = scmp.lt.s32.totalorder %s703_s23, %s703_s23 }
  0x57   : > { %p5033_p2 = scmp.lt.s32.totalorder %s5024_s30, %s5024_s30 }
  0x58   : > { %p5027_p12 = pnand %p5025_p11, %p5679_p7 }
  0x59   : > { %4779 = dma.hbm_to_vmem [thread:$0]  (!%p5671_p6), %s6480_s10, 512, %s5675_s8, [#allocation15], %s6422_s6, %s6422_s6, %s6424_s7  }
  0x5a   : > { %p5028_p13 = pneg %p5027_p12  ;;  %p5034_p5 = por %p5033_p2, %p5032_p0 }
  0x5c   : > { %p5035_p9 = pnand %p5034_p5, %p5028_p13 }
  0x5e   : > { %5038 = shalt.err (!%p5035_p9)
}
  0x5f   : > { %s6481_s12 = sld [smem:[#allocation58_spill]]  ;;  %s5050_s1 = scalar_lea.vmem %s730_s2, 16 }
  0x60   : > { %p5051_p8 = scmp.ne.s32.totalorder %s730_s2, %s5050_s1  ;;  %s5057_s21 = scalar_lea.vmem %s730_s2, 32 }
  0x61   : > { %p5058_p12 = scmp.lt.s32.totalorder %s730_s2, %s730_s2  ;;  %p5059_p13 = scmp.lt.s32.totalorder %s5057_s21, %s5050_s1 }
  0x62   : > { %p5053_p10 = pnand %p5051_p8, %p5679_p7 }
  0x63   : > { %p5060_p0 = por %p5059_p13, %p5058_p12 }
  0x64   : > { %p5054_p11 = pneg %p5053_p10 }
  0x65   : > { %4785 = dma.hbm_to_vmem [thread:$0]  (!%p5671_p6), %s6481_s12, 512, %s703_s23, [#allocation18], %s6422_s6, %s6422_s6, %s6424_s7  }
  0x66   : > { %p5061_p2 = pnand %p5060_p0, %p5054_p11 }
  0x68   : > { %5064 = shalt.err (!%p5061_p2)
}
  0x69   : > { %s6482_s14 = sld [smem:[#allocation59_spill]]  ;;  %s5494_s19 = smov [#allocation23]  }
  0x6a   : > { %s750_s23 = sshll.u32 %s5494_s19, 4  ;;  %s751_s23 = int_to_ptr.vmem [resolvable:$true] %s750_s23 }
  0x6b   : > { %s5076_s24 = scalar_lea.vmem %s751_s23, 512  ;;  %p5084_p10 = scmp.lt.s32.totalorder %s751_s23, %s751_s23 }
  0x6c   : > { %p5077_p5 = scmp.ne.s32.totalorder %s751_s23, %s5076_s24  ;;  %p5085_p4 = scmp.lt.s32.totalorder %s5076_s24, %s5076_s24 }
  0x6e   : > { %p5079_p9 = pnand %p5077_p5, %p5679_p7  ;;  %p5086_p12 = por %p5085_p4, %p5084_p10 }
  0x6f   : > { %4791 = dma.hbm_to_vmem [thread:$0]  (!%p5671_p6), %s6482_s14, 16, %s730_s2, [#allocation21]  }
  0x70   : > { %p5080_p8 = pneg %p5079_p9 }
  0x72   : > { %p5087_p11 = pnand %p5086_p12, %p5080_p8 }
  0x74   : > { %5090 = shalt.err (!%p5087_p11)
}
  0x75   : > { %s6483_s16 = sld [smem:[#allocation60_spill]]  ;;  %s6421_s8 = sadd.s32 4294967294, %s5485_s28  }
  0x76   : > { %s5744_s25 = sadd.s32 1, %s5485_s28   ;;  %s62_s21 = sadd.s32 1, %s5481_s27 }
  0x77   : > { %6484 = sst [smem:[#allocation42_spill]] %s5744_s25  ;;  %s59_s1 = ssub.s32 %s5485_s28, %s5744_s25 }
  0x78   : > { %p60_p4 = scmp.eq.s32.totalorder %s59_s1, 0  ;;  %p69_p13 = scmp.ne.s32.totalorder %s5481_s27, %s5477_s26 }
  0x79   : > { %p70_p0 = scmp.eq.s32.totalorder %s5485_s28, 0  ;;  %p75_p2 = scmp.ne.s32.totalorder %s5477_s26, %s5473_s5 }
  0x7a   : > { %s5755_s20 = scalar_select %p60_p4, %s5481_s27, %s62_s21  }
  0x7b   : > { %4797 = dma.hbm_to_vmem [thread:$0]  (!%p5671_p6), %s6483_s16, 512, %s751_s23, [#allocation24], %s6422_s6, %s6422_s6, %s6424_s7  }
  0x7c   : > { %6485 = sst [smem:[#allocation43_spill]] %s5755_s20  ;;  %p71_p5 = por %p70_p0, %p69_p13 }
  0x7d   : > { %p5759_p9 = por %p6430_p1, %p75_p2  ;;  %p555_p8 = scmp.eq.s32.totalorder %s5657_s29, 1 }
  0x7e   : > { %p561_p10 = scmp.eq.s32.totalorder %s6421_s8, 1  ;;  %p4835_p12 = scmp.lt.s32.totalorder %s5485_s28, 2 }
  0x7f   : > { %s6486_s22 = scalar_select %p5759_p9, 1, 0 }
  0x80   : > { %s6426_s19 = sand.u32 1, %s5481_s27   ;;  %p5768_p11 = por %p555_p8, %p69_p13 }
  0x81   : > { %p5772_p3 = por %p561_p10, %p75_p2  ;;  %s5778_s30 = sshll.u32 %s6426_s19, 3 }
  0x82   : > { %s6487_s23 = scalar_select %p5768_p11, 1, 0 }
  0x83   : > { %s6489_s24 = scalar_select %p5772_p3, 1, 0 }
  0x84   : > { %6488 = sst [smem:[#allocation44_spill]] %s6487_s23  ;;  %s5781_s2 = sshll.u32 %s5485_s28, 7 }
  0x85   : > { %6490 = sst [smem:[#allocation45_spill]] %s6489_s24  ;;  %p5783_p4 = pnand %p4835_p12, %p71_p5 }
  0x86   : > { %s6431_s21 = sand.u32 1, %s5485_s28   ;;  %s6492_s7 = sld [smem:[#allocation47_spill]] }
  0x87   : > { %s6491_s1 = scalar_select %p5783_p4, 1, 0 }
  0x88   : > { %s809_s19 = scalar_lea.vmem [#allocation5], %s5778_s30  ;;  %s5797_s14 = scalar_lea.sflag [#allocation6], %s6431_s21 }
  0x89   : > { %s816_s12 = sshll.u32 %s809_s19, 4  ;;  %p5803_p0 = pneg %p5783_p4  ;;  %s817_s12 = int_to_ptr.vmem [resolvable:$true] %s816_s12 }
  0x8b   : > { %s6493_s20 = scalar_select %p5803_p0, 1, 0 }
  0x8c   : > { %s5792_s10 = scalar_lea.hbm %s6492_s7, %s5781_s2  ;;  %s5096_s25 = scalar_lea.hbm %s6492_s7, 256 }
  0x8d   : > { %s5091_s16 = scalar_lea.hbm %s5792_s10, 128  ;;  %p5097_p8 = scmp.lt.s32.totalorder %s5792_s10, %s6492_s7 }
  0x8e   : > { %p5092_p13 = scmp.ne.s32.totalorder %s5792_s10, %s5091_s16  ;;  %p5098_p10 = scmp.lt.s32.totalorder %s5096_s25, %s5091_s16 }
  0x90   : > { %p5094_p2 = pnand %p5803_p0, %p5092_p13  ;;  %p5099_p12 = por %p5098_p10, %p5097_p8 }
  0x92   : > { %p5095_p5 = pneg %p5094_p2 }
  0x94   : > { %p5100_p1 = pnand %p5099_p12, %p5095_p5 }
  0x96   : > { %5103 = shalt.err (!%p5100_p1)
}
  0x97   : > { %s5104_s21 = scalar_lea.vmem %s817_s12, 128  ;;  %s5495_s5 = smov [#allocation5]  }
  0x98   : > { %p5105_p3 = scmp.ne.s32.totalorder %s817_s12, %s5104_s21  ;;  %s5109_s23 = sshll.u32 %s5495_s5, 4  ;;  %s5110_s23 = int_to_ptr.vmem [resolvable:$false] %s5109_s23 }
  0x99   : > { %s5111_s18 = scalar_lea.vmem %s5110_s23, 256  ;;  %p5112_p13 = scmp.lt.s32.totalorder %s817_s12, %s5110_s23 }
  0x9a   : > { %p5107_p11 = pnand %p5105_p3, %p5803_p0  ;;  %p5113_p2 = scmp.lt.s32.totalorder %s5111_s18, %s5104_s21 }
  0x9c   : > { %p5108_p9 = pneg %p5107_p11  ;;  %p5114_p6 = por %p5113_p2, %p5112_p13 }
  0x9e   : > { %p5115_p7 = pnand %p5114_p6, %p5108_p9 }
  0xa0   : > { %5118 = shalt.err (!%p5115_p7)
}
  0xa1   : > { %4807 = dma.hbm_to_vmem [thread:$0]  (!%p5783_p4), %s5792_s10, 128, %s817_s12, %s5797_s14  }
  0xa2   : > { %s5496_s16 = smov [#allocation13]   ;;  %s5497_s24 = smov [#allocation16]  }
  0xa3   : > { %s666_s25 = sshll.u32 %s5496_s16, 4  ;;  %s689_s6 = sshll.u32 %s5497_s24, 4  ;;  %s667_s25 = int_to_ptr.vmem [resolvable:$true] %s666_s25  ;;  %s690_s6 = int_to_ptr.vmem [resolvable:$true] %s689_s6 }
  0xa4   : > { %s5130_s8 = scalar_lea.vmem %s667_s25, 16  ;;  %p6494_p3 = scmp.ne.s32.totalorder %s6477_s4, 0 }
  0xa5   : > { %p5131_p1 = scmp.ne.s32.totalorder %s667_s25, %s5130_s8  ;;  %s5137_s18 = scalar_lea.vmem %s667_s25, 32 }
  0xa6   : > { %p5138_p8 = scmp.lt.s32.totalorder %s667_s25, %s667_s25  ;;  %p5139_p6 = scmp.lt.s32.totalorder %s5137_s18, %s5130_s8 }
  0xa7   : > { %p5133_p11 = pnand %p5131_p1, %p6494_p3 }
  0xa8   : > { %p5140_p7 = por %p5139_p6, %p5138_p8 }
  0xa9   : > { %p5134_p5 = pneg %p5133_p11 }
  0xab   : > { %p5141_p9 = pnand %p5140_p7, %p5134_p5 }
  0xad   : > { %5144 = shalt.err (!%p5141_p9)
}
  0xae   : > { %p6495_p10 = scmp.ne.s32.totalorder %s6476_s3, 0  ;;  %s6496_s9 = sld [smem:[#allocation55_spill]] }
  0xaf   : > { %s5156_s12 = scalar_lea.vmem %s690_s6, 512  ;;  %p5164_p1 = scmp.lt.s32.totalorder %s690_s6, %s690_s6 }
  0xb0   : > { %p5157_p12 = scmp.ne.s32.totalorder %s690_s6, %s5156_s12  ;;  %p5165_p11 = scmp.lt.s32.totalorder %s5156_s12, %s5156_s12 }
  0xb2   : > { %p5159_p13 = pnand %p5157_p12, %p6494_p3  ;;  %p5166_p4 = por %p5165_p11, %p5164_p1 }
  0xb4   : > { %4776 = dma.hbm_to_vmem [thread:$0]  (!%p6495_p10), %s6496_s9, 16, %s667_s25, [#allocation12]  }
  0xb5   : > { %p5160_p2 = pneg %p5159_p13 }
  0xb7   : > { %p5167_p0 = pnand %p5166_p4, %p5160_p2 }
  0xb9   : > { %5170 = shalt.err (!%p5167_p0)
}
  0xba   : > { %s6497_s23 = smov 8   ;;  %s6498_s21 = smov 128  }
  0xbb   : > { %s6499_s11 = sld [smem:[#allocation57_spill]]  ;;  %s5498_s25 = smov [#allocation19]  }
  0xbc   : > { %s715_s24 = sshll.u32 %s5498_s25, 4  ;;  %s5499_s8 = smov [#allocation22]   ;;  %s716_s24 = int_to_ptr.vmem [resolvable:$true] %s715_s24 }
  0xbd   : > { %s740_s18 = sshll.u32 %s5499_s8, 4  ;;  %s5182_s5 = scalar_lea.vmem %s716_s24, 512  ;;  %s741_s18 = int_to_ptr.vmem [resolvable:$true] %s740_s18 }
  0xbe   : > { %p5183_p5 = scmp.ne.s32.totalorder %s716_s24, %s5182_s5  ;;  %p5190_p8 = scmp.lt.s32.totalorder %s716_s24, %s716_s24 }
  0xbf   : > { %p5191_p6 = scmp.lt.s32.totalorder %s5182_s5, %s5182_s5 }
  0xc0   : > { %p5185_p4 = pnand %p5183_p5, %p6494_p3 }
  0xc1   : > { %4782 = dma.hbm_to_vmem [thread:$0]  (!%p6495_p10), %s6499_s11, 512, %s690_s6, [#allocation15], %s6498_s21, %s6498_s21, %s6497_s23  }
  0xc2   : > { %p5186_p0 = pneg %p5185_p4  ;;  %p5192_p7 = por %p5191_p6, %p5190_p8 }
  0xc4   : > { %p5193_p9 = pnand %p5192_p7, %p5186_p0 }
  0xc6   : > { %5196 = shalt.err (!%p5193_p9)
}
  0xc7   : > { %4788 = dma.hbm_to_vmem [thread:$0]  (!%p6495_p10), %s6398_s13, 512, %s716_s24, [#allocation18], %s6498_s21, %s6498_s21, %s6497_s23  }
  0xc8   : > { %s5208_s12 = scalar_lea.vmem %s741_s18, 16  ;;  %s5215_s19 = scalar_lea.vmem %s741_s18, 32 }
  0xc9   : > { %p5209_p12 = scmp.ne.s32.totalorder %s741_s18, %s5208_s12  ;;  %p5216_p1 = scmp.lt.s32.totalorder %s741_s18, %s741_s18 }
  0xca   : > { %p5217_p11 = scmp.lt.s32.totalorder %s5215_s19, %s5208_s12 }
  0xcb   : > { %p5211_p13 = pnand %p5209_p12, %p6494_p3 }
  0xcc   : > { %p5218_p5 = por %p5217_p11, %p5216_p1 }
  0xcd   : > { %p5212_p2 = pneg %p5211_p13 }
  0xcf   : > { %p5219_p4 = pnand %p5218_p5, %p5212_p2 }
  0xd1   : > { %5222 = shalt.err (!%p5219_p4)
}
  0xd2   : > { %4794 = dma.hbm_to_vmem [thread:$0]  (!%p6495_p10), %s6400_s15, 16, %s741_s18, [#allocation21]  }
  0xd3   : > { %s5500_s23 = smov [#allocation25]  }
  0xd4   : > { %s764_s21 = sshll.u32 %s5500_s23, 4  ;;  %s765_s21 = int_to_ptr.vmem [resolvable:$true] %s764_s21 }
  0xd5   : > { %s5234_s24 = scalar_lea.vmem %s765_s21, 16  ;;  %s5241_s8 = scalar_lea.vmem %s765_s21, 32 }
  0xd6   : > { %p5235_p0 = scmp.ne.s32.totalorder %s765_s21, %s5234_s24  ;;  %p5242_p7 = scmp.lt.s32.totalorder %s765_s21, %s765_s21 }
  0xd7   : > { %p5243_p9 = scmp.lt.s32.totalorder %s5241_s8, %s5234_s24 }
  0xd8   : > { %p5237_p8 = pnand %p5235_p0, %p6494_p3 }
  0xd9   : > { %p5244_p12 = por %p5243_p9, %p5242_p7 }
  0xda   : > { %p5238_p6 = pneg %p5237_p8 }
  0xdc   : > { %p5245_p13 = pnand %p5244_p12, %p5238_p6 }
  0xde   : > { %5248 = shalt.err (!%p5245_p13)
}
  0xdf   : > { %4800 = dma.hbm_to_vmem [thread:$0]  (!%p6495_p10), %s6402_s17, 16, %s765_s21, [#allocation24]  }
  0xe0   : > { %s6500_s10 = sld [smem:[#allocation46_spill]]  ;;  %s791_s19 = scalar_lea.vmem [#allocation2], %s5778_s30 }
  0xe1   : > { %s798_s16 = sshll.u32 %s791_s19, 4  ;;  %s6501_s3 = sand.u32 1, %s5481_s27   ;;  %s799_s16 = int_to_ptr.vmem [resolvable:$true] %s798_s16 }
  0xe2   : > { %s788_s25 = scalar_lea.sflag [#allocation3], %s6501_s3  ;;  %p6502_p2 = scmp.ne.s32.totalorder %s6493_s20, 0 }
  0xe6   : > { %s5867_s12 = scalar_lea.hbm %s6500_s10, %s5781_s2  ;;  %s5254_s8 = scalar_lea.hbm %s6500_s10, 256 }
  0xe7   : > { %s5249_s23 = scalar_lea.hbm %s5867_s12, 128  ;;  %p5255_p10 = scmp.lt.s32.totalorder %s5867_s12, %s6500_s10 }
  0xe8   : > { %p5250_p3 = scmp.ne.s32.totalorder %s5867_s12, %s5249_s23  ;;  %p5256_p5 = scmp.lt.s32.totalorder %s5254_s8, %s5249_s23 }
  0xea   : > { %p5252_p1 = pnand %p5250_p3, %p6502_p2  ;;  %p5257_p4 = por %p5256_p5, %p5255_p10 }
  0xec   : > { %p5253_p11 = pneg %p5252_p1 }
  0xee   : > { %p5258_p0 = pnand %p5257_p4, %p5253_p11 }
  0xf0   : > { %5261 = shalt.err (!%p5258_p0)
}
  0xf1   : > { %s5262_s18 = scalar_lea.vmem %s799_s16, 128  ;;  %s5501_s4 = smov [#allocation2]  }
  0xf2   : > { %p5263_p8 = scmp.ne.s32.totalorder %s799_s16, %s5262_s18  ;;  %s5267_s19 = sshll.u32 %s5501_s4, 4  ;;  %s5268_s19 = int_to_ptr.vmem [resolvable:$false] %s5267_s19 }
  0xf3   : > { %s5269_s3 = scalar_lea.vmem %s5268_s19, 256  ;;  %p5270_p9 = scmp.lt.s32.totalorder %s799_s16, %s5268_s19 }
  0xf4   : > { %p5265_p6 = pnand %p5263_p8, %p6502_p2  ;;  %p5271_p12 = scmp.lt.s32.totalorder %s5269_s3, %s5262_s18 }
  0xf6   : > { %p5266_p7 = pneg %p5265_p6  ;;  %p5272_p13 = por %p5271_p12, %p5270_p9 }
  0xf8   : > { %p5273_p3 = pnand %p5272_p13, %p5266_p7 }
  0xfa   : > { %5276 = shalt.err (!%p5273_p3)
}
  0xfb   : > { %p6503_p1 = scmp.ne.s32.totalorder %s6491_s1, 0  ;;  %s6504_s21 = sld [smem:[#allocation48_spill]] }
  0xfc   : > { %s827_s5 = scalar_lea.vmem [#allocation7], %s5778_s30 }
  0xfd   : > { %4804 = dma.hbm_to_vmem [thread:$0]  (!%p6503_p1), %s5867_s12, 128, %s799_s16, %s788_s25  }
  0xfe   : > { %s834_s6 = sshll.u32 %s827_s5, 4  ;;  %s835_s6 = int_to_ptr.vmem [resolvable:$true] %s834_s6 }
 0x101   : > { %s832_s8 = scalar_lea.hbm %s6504_s21, %s5781_s2  ;;  %s5282_s3 = scalar_lea.hbm %s6504_s21, 256 }
 0x102   : > { %s5277_s4 = scalar_lea.hbm %s832_s8, 128  ;;  %p5283_p4 = scmp.lt.s32.totalorder %s832_s8, %s6504_s21 }
 0x103   : > { %p5278_p11 = scmp.ne.s32.totalorder %s832_s8, %s5277_s4  ;;  %p5284_p0 = scmp.lt.s32.totalorder %s5282_s3, %s5277_s4 }
 0x105   : > { %p5280_p10 = pnand %p5278_p11, %p6502_p2  ;;  %p5285_p8 = por %p5284_p0, %p5283_p4 }
 0x107   : > { %p5281_p5 = pneg %p5280_p10 }
 0x109   : > { %p5286_p6 = pnand %p5285_p8, %p5281_p5 }
 0x10b   : > { %5289 = shalt.err (!%p5286_p6)
}
 0x10c   : > { %s5290_s12 = scalar_lea.vmem %s835_s6, 128  ;;  %s5502_s16 = smov [#allocation7]  }
 0x10d   : > { %p5291_p7 = scmp.ne.s32.totalorder %s835_s6, %s5290_s12  ;;  %s5295_s25 = sshll.u32 %s5502_s16, 4  ;;  %s5296_s25 = int_to_ptr.vmem [resolvable:$false] %s5295_s25 }
 0x10e   : > { %s5297_s23 = scalar_lea.vmem %s5296_s25, 256  ;;  %p5298_p13 = scmp.lt.s32.totalorder %s835_s6, %s5296_s25 }
 0x10f   : > { %p5293_p9 = pnand %p5291_p7, %p6502_p2  ;;  %p5299_p3 = scmp.lt.s32.totalorder %s5297_s23, %s5290_s12 }
 0x111   : > { %p5294_p12 = pneg %p5293_p9  ;;  %p5300_p11 = por %p5299_p3, %p5298_p13 }
 0x113   : > { %p5301_p10 = pnand %p5300_p11, %p5294_p12 }
 0x115   : > { %5304 = shalt.err (!%p5301_p10)
}
 0x116   : > { %4810 = dma.hbm_to_vmem [thread:$0]  (!%p6503_p1), %s832_s8, 128, %s835_s6, %s5797_s14  }
 0x117   : > { %s6505_s24 = sld [smem:[#allocation49_spill]]  ;;  %s845_s4 = scalar_lea.vmem [#allocation8], %s5778_s30 }
 0x118   : > { %s852_s18 = sshll.u32 %s845_s4, 4  ;;  %s6506_s19 = sand.u32 1, %s5485_s28   ;;  %s853_s18 = int_to_ptr.vmem [resolvable:$true] %s852_s18 }
 0x119   : > { %s842_s3 = scalar_lea.sflag [#allocation9], %s6506_s19 }
 0x11d   : > { %s5910_s5 = scalar_lea.hbm %s6505_s24, %s5781_s2  ;;  %s5310_s8 = scalar_lea.hbm %s6505_s24, 256 }
 0x11e   : > { %s5305_s12 = scalar_lea.hbm %s5910_s5, 128  ;;  %p5311_p8 = scmp.lt.s32.totalorder %s5910_s5, %s6505_s24 }
 0x11f   : > { %p5306_p5 = scmp.ne.s32.totalorder %s5910_s5, %s5305_s12  ;;  %p5312_p6 = scmp.lt.s32.totalorder %s5310_s8, %s5305_s12 }
 0x121   : > { %p5308_p4 = pnand %p5306_p5, %p6502_p2  ;;  %p5313_p7 = por %p5312_p6, %p5311_p8 }
 0x123   : > { %p5309_p0 = pneg %p5308_p4 }
 0x125   : > { %p5314_p9 = pnand %p5313_p7, %p5309_p0 }
 0x127   : > { %5317 = shalt.err (!%p5314_p9)
}
 0x128   : > { %s5318_s30 = scalar_lea.vmem %s853_s18, 128  ;;  %s5503_s25 = smov [#allocation8]  }
 0x129   : > { %p5319_p12 = scmp.ne.s32.totalorder %s853_s18, %s5318_s30  ;;  %s5323_s23 = sshll.u32 %s5503_s25, 4  ;;  %s5324_s23 = int_to_ptr.vmem [resolvable:$false] %s5323_s23 }
 0x12a   : > { %s5325_s9 = scalar_lea.vmem %s5324_s23, 256  ;;  %p5326_p11 = scmp.lt.s32.totalorder %s853_s18, %s5324_s23 }
 0x12b   : > { %p5321_p13 = pnand %p5319_p12, %p6502_p2  ;;  %p5327_p10 = scmp.lt.s32.totalorder %s5325_s9, %s5318_s30 }
 0x12d   : > { %p5322_p3 = pneg %p5321_p13  ;;  %p5328_p5 = por %p5327_p10, %p5326_p11 }
 0x12f   : > { %p5329_p4 = pnand %p5328_p5, %p5322_p3 }
 0x131   : > { %5332 = shalt.err (!%p5329_p4)
}
 0x132   : > { %4813 = dma.hbm_to_vmem [thread:$0]  (!%p6503_p1), %s5910_s5, 128, %s853_s18, %s842_s3  }
 0x133   : > { %p6507_p0 = scmp.ne.s32.totalorder %s6475_s0, 0 }
 0x134   : > { %s5934_s20 = sand.u32 (!%p6507_p0), 1, %s5477_s26   ;;  %p6508_p2 = scmp.ne.s32.totalorder (!%p6507_p0), %s6486_s22, 0 }
 0x135   : > { %861 = sbr.rel (%p6507_p0) target bundleno = 4922 (0x133a), region = 108  ;;  %s5937_s7 = sshll.u32 (!%p6507_p0), %s5934_s20, 3 }
 0x136   : > { %s864_s4 = scalar_lea.sflag (!%p6507_p0), [#allocation3], %s5934_s20  ;;  %s867_s19 = scalar_lea.vmem (!%p6507_p0), [#allocation2], %s5937_s7 }
 0x13a   : > { %5428 = dma.done.wait (%p6508_p2), %s864_s4, 128  }
 0x13b   : > { %5430 = vsyncadd (%p6508_p2), %s864_s4, 4294967168  ;;  %s5946_s0 = sand.u32 1, %s5657_s29   ;;  %s876_s5 = scalar_lea.vmem [#allocation5], %s5937_s7 }
 0x13c   : > { %s873_s1 = scalar_lea.sflag [#allocation6], %s5946_s0 }
 0x13d   : > { %5432 = dma.done.wait (%p6508_p2), %s873_s1, 256  }
 0x13e   : > { %5434 = vsyncadd (%p6508_p2), %s873_s1, 4294967040  ;;  %s885_s18 = scalar_lea.vmem [#allocation7], %s5937_s7  ;;  %s891_s3 = scalar_lea.sflag [#allocation9], %s5946_s0 }
 0x13f   : > { %s894_s12 = scalar_lea.vmem [#allocation8], %s5937_s7 }
 0x140   : > { %5436 = dma.done.wait (%p6508_p2), %s891_s3, 128  }
 0x141   : > { %5438 = vsyncadd (%p6508_p2), %s891_s3, 4294967168  ;;  %p6509_p1 = scmp.eq.s32.totalorder %s5657_s29, 0 }
 0x143   : > { %5440 = dma.done.wait (%p6509_p1), [#allocation9], 512   ;;  %p6510_p8 = pmov %p6509_p1 }
 0x144   : > { %p6511_p6 = pmov %p6509_p1 }
 0x145   : > { %5442 = vsyncadd (%p6510_p8), [#allocation9], 4294966784 }
 0x146   : > { %5444 = dma.done.wait (%p6511_p6), [#allocation12], 32   ;;  %p6512_p7 = pmov %p6509_p1 }
 0x147   : > { %p6513_p9 = pmov %p6509_p1 }
 0x148   : > { %5446 = vsyncadd (%p6512_p7), [#allocation12], 4294967264 }
 0x149   : > { %5448 = dma.done.wait (%p6513_p9), [#allocation15], 1024   ;;  %p6514_p12 = pmov %p6509_p1 }
 0x14a   : > { %p6515_p13 = pmov %p6509_p1 }
 0x14b   : > { %5450 = vsyncadd (%p6514_p12), [#allocation15], 4294966272 }
 0x14c   : > { %5452 = dma.done.wait (%p6515_p13), [#allocation18], 1024   ;;  %p6516_p3 = pmov %p6509_p1 }
 0x14d   : > { %p6517_p11 = pmov %p6509_p1 }
 0x14e   : > { %5454 = vsyncadd (%p6516_p3), [#allocation18], 4294966272 }
 0x14f   : > { %5456 = dma.done.wait (%p6517_p11), [#allocation21], 32   ;;  %p6518_p10 = pmov %p6509_p1 }
 0x150   : > { %p6519_p5 = pmov %p6509_p1 }
 0x151   : > { %5458 = vsyncadd (%p6518_p10), [#allocation21], 4294967264 }
 0x152   : > { %5460 = dma.done.wait (%p6519_p5), [#allocation24], 528   ;;  %p6520_p4 = pmov %p6509_p1 }
 0x153   : > { %v5504_v0 = vmov 0.0   ;;  %vm5505_vm0 = vmmov 0   ;;  %s6521_s14 = sld [smem:[#allocation50_spill]]  ;;  %v6007_v5 = vld [vmem:[%s867_s19] sm:$0xff]  ;;  %vm1050_vm1 = vcmask 261120   ;;  %vm1489_vm2 = vcmask 64512  }
 0x154   : > { %5462 = vsyncadd (%p6520_p4), [#allocation24], 4294966768  ;;  %4511 = vmatprep.subr.mxu1 %v5504_v0  ;;  %4519 = vmatprep.mubr.msk.f32.mxu1 %vm5505_vm0, %v5504_v0  ;;  %s6522_s1 = sld [smem:[#allocation51_spill]]  ;;  %v1030_v33 = vld [vmem:[%s885_s18] sm:$0xff]  ;;  %s4369_s18 = sshll.u32 %s5934_s20, 5  ;;  %vm3860_vm5 = vcmask 523264  }
 0x155   : > { %4533 = vmatprep.subr.mxu0 %v5504_v0  ;;  %4541 = vmatprep.mubr.msk.f32.mxu0 %vm5505_vm0, %v5504_v0  ;;  %s6523_s25 = sld [smem:[#allocation52_spill]]  ;;  %vm1782_vm3 = vcmp.eq.f32.partialorder %v1030_v33, 0.0  ;;  %s6088_s16 = scalar_lea.vmem [#allocation27], %s4369_s18  ;;  %v1045_v33 = vld [vmem:[#allocation10 + $0x8] sm:$0xff] }
 0x156   : > { %s6524_s6 = sld [smem:[#allocation61_spill]]  ;;  %s6448_s19 = sshll.u32 %s5657_s29, 9 }
 0x157   : > { %s6525_s3 = sld [smem:[#allocation62_spill]]  ;;  %s4010_s30 = sshll.u32 %s6088_s16, 4  ;;  %s6282_s30 = int_to_ptr.vmem [resolvable:$true] %s4010_s30 }
 0x158   : > { %s6526_s22 = sld [smem:[#allocation44_spill]]  ;;  %s5333_s9 = scalar_lea.vmem %s6282_s30, 512 }
 0x159   : > { %v1035_v1 = vld [vmem:[%s6521_s14 + $0x18] sm:$0xff]  ;;  %v1034_v2 = vld [vmem:[%s6521_s14 + $0x10] sm:$0xff]  ;;  %v1033_v3 = vld [vmem:[%s6521_s14 + $0x8] sm:$0xff]  ;;  %s6527_s8 = sld [smem:[#allocation66_spill]]  ;;  %p5334_p0 = scmp.ne.s32.totalorder %s6282_s30, %s5333_s9 }
 0x15a   : > { %4512 = vmatpush3.msra.mxu1 %v1035_v1  ;;  %v1032_v4 = vld [vmem:[%s6521_s14] sm:$0xff]  ;;  %v1039_v6 = vld [vmem:[%s6522_s1 + $0x18] sm:$0xff]  ;;  %v1038_v7 = vld [vmem:[%s6522_s1 + $0x10] sm:$0xff]  ;;  %s5506_s4 = smov [#allocation27]  }
 0x15b   : > { %4513 = vmatprep.subr.mxu1 %v5504_v0  ;;  %v1037_v8 = vld [vmem:[%s6522_s1 + $0x8] sm:$0xff]  ;;  %v1036_v9 = vld [vmem:[%s6522_s1] sm:$0xff]  ;;  %v1043_v15 = vld [vmem:[%s6523_s25 + $0x18] sm:$0xff] }
 0x15c   : > { %4514 = vmatpush3.msra.mxu1 %v1034_v2  ;;  %4534 = vmatpush3.msra.mxu0 %v1043_v15  ;;  %v1042_v16 = vld [vmem:[%s6523_s25 + $0x10] sm:$0xff]  ;;  %v1041_v17 = vld [vmem:[%s6523_s25 + $0x8] sm:$0xff]  ;;  %v1040_v18 = vld [vmem:[%s6523_s25] sm:$0xff] }
 0x15d   : > { %4515 = vmatprep.subr.mxu1 %v5504_v0  ;;  %4535 = vmatprep.subr.mxu0 %v5504_v0 }
 0x15e   : > { %4516 = vmatpush3.msra.mxu1 %v1033_v3  ;;  %4536 = vmatpush3.msra.mxu0 %v1042_v16  ;;  %p6528_p2 = scmp.ne.s32.totalorder %s6526_s22, 0 }
 0x15f   : > { %4517 = vmatprep.subr.mxu1 %v5504_v0  ;;  %4537 = vmatprep.subr.mxu0 %v5504_v0  ;;  %s6279_s2 = scalar_lea.hbm %s6527_s8, %s6448_s19 }
 0x160   : > { %4518 = vmatpush3.msra.mxu1 %v1032_v4  ;;  %4538 = vmatpush3.msra.mxu0 %v1041_v17  ;;  %p5335_p1 = pnand %p5334_p0, %p6528_p2 }
 0x161   : > { %4520 = vmatmul.mubr.msk.f32.vlgmr.msra.gmra.mxu1 %vm1050_vm1, %v6007_v5  ;;  %4522 = vmatprep.subr.mxu1 %v5504_v0 }
 0x162   : > { %4523 = vmatpush3.msra.mxu1 %v1039_v6  ;;  %4530 = vmatprep.mubr.msk.f32.mxu1 %vm5505_vm0, %v5504_v0  ;;  %p5336_p8 = pneg %p5335_p1 }
 0x163   : > { %4524 = vmatprep.subr.mxu1 %v5504_v0  ;;  %4539 = vmatprep.subr.mxu0 %v5504_v0 }
 0x164   : > { %4525 = vmatpush3.msra.mxu1 %v1038_v7  ;;  %4540 = vmatpush3.msra.mxu0 %v1040_v18 }
 0x165   : > { %4526 = vmatprep.subr.mxu1 %v5504_v0  ;;  %4542 = vmatmul.mubr.msk.f32.vlgmr.msra.gmra.mxu0 %vm1050_vm1, %v6007_v5 }
 0x166   : > { %4527 = vmatpush3.msra.mxu1 %v1037_v8  ;;  %4554 = vmatprep.subr.mxu0 %v5504_v0 }
 0x167   : > { %4528 = vmatprep.subr.mxu1 %v5504_v0  ;;  %4556 = vmatprep.mubr.msk.f32.mxu0 %vm5505_vm0, %v5504_v0 }
 0x168   : > { %4529 = vmatpush3.msra.mxu1 %v1036_v9 }
 0x169   : > { %4531 = vmatmul.mubr.msk.f32.vlgmr.msra.gmra.mxu1 %vm1050_vm1, %v6007_v5  ;;  %4544 = vmatprep.subr.mxu1 %v5504_v0 }
 0x16a   : > { %4546 = vmatprep.mubr.msk.f32.mxu1 %vm5505_vm0, %v5504_v0 }
 0x221   : > { %v1120_v10 = vpop.f32.mrf.mxu1 }
 0x222   : > { %v1264_v11 = vmul.f32 0.35355338, %v1120_v10 }
 0x223   : > { %v4521_v12 = vpop.f32.mrf.mxu1 }
 0x224   : > { %1265 = vxpose.xlu0.b32.start.end [1/1] (short) (narrow) %v1264_v11, 32 }
 0x225   : > { %v1260_v31 = vpop.f32.mrf.mxu0 }
 0x227   : > { %v4543_v32 = vpop.f32.mrf.mxu0 }
 0x229   : > { %v1190_v13 = vpop.f32.mrf.mxu1 }
 0x22b   : > { %v4532_v14 = vpop.f32.mrf.mxu1 }
 0x231   : > { %1297 = vxpose.xlu0.b32.start.end [1/1] (short) (narrow) %v1190_v13, 32 }
 0x2a0   : > { %v1281_v19 = vpop.trf.xlu0 }
 0x2a1   : > { %1361 = vxpose.xlu1.b32.start.end [1/1] (short) (narrow) %v1281_v19, 8 }
 0x2a4   : > { %v1282_v20 = vpop.trf.xlu0 }
 0x2a5   : > { %1393 = vxpose.xlu1.b32.start.end [1/1] (short) (narrow) %v1282_v20, 8 }
 0x2a8   : > { %v1283_v21 = vpop.trf.xlu0 }
 0x2a9   : > { %1425 = vxpose.xlu1.b32.start.end [1/1] (short) (narrow) %v1283_v21, 8 }
 0x2ac   : > { %v1284_v22 = vpop.trf.xlu0 }
 0x2ad   : > { %1457 = vxpose.xlu1.b32.start.end [1/1] (short) (narrow) %v1284_v22, 8 }
 0x2b0   : > { %v1313_v23 = vpop.trf.xlu0 }
 0x2b1   : > { %4545 = vmatpush3.msra.mxu1 %v1313_v23 }
 0x2b2   : > { %4549 = vmatprep.subr.mxu1 %v5504_v0 }
 0x2b4   : > { %v1314_v24 = vpop.trf.xlu0 }
 0x2b8   : > { %v1315_v25 = vpop.trf.xlu0 }
 0x2b9   : > { %4555 = vmatpush3.msra.mxu0 %v1315_v25 }
 0x2ba   : > { %4564 = vmatprep.subr.mxu0 %v5504_v0 }
 0x2bc   : > { %v1316_v27 = vpop.trf.xlu0 }
 0x31d   : > { %v1377_v26 = vpop.trf.xlu1 }
 0x31e   : > { %4547 = vmatmul.mubr.msk.f32.vlgmr.msra.gmra.mxu1 %vm1489_vm2, %v1377_v26 }
 0x31f   : > { %4550 = vmatpush3.msra.mxu1 %v1314_v24  ;;  %4551 = vmatprep.mubr.msk.f32.mxu1 %vm5505_vm0, %v5504_v0 }
 0x320   : > { %4559 = vmatprep.subr.mxu1 %v5504_v0 }
 0x321   : > { %v1409_v28 = vpop.trf.xlu1 }
 0x322   : > { %4552 = vmatmul.mubr.msk.f32.vlgmr.msra.gmra.mxu1 %vm1489_vm2, %v1409_v28 }
 0x323   : > { %4560 = vmatpush3.msra.mxu1 %v1316_v27  ;;  %4561 = vmatprep.mubr.msk.f32.mxu1 %vm5505_vm0, %v5504_v0 }
 0x324   : > { %4569 = vmatprep.subr.mxu1 %v5504_v0 }
 0x325   : > { %v1441_v29 = vpop.trf.xlu1 }
 0x326   : > { %4557 = vmatmul.mubr.msk.f32.vlgmr.msra.gmra.mxu0 %vm1489_vm2, %v1441_v29 }
 0x327   : > { %4566 = vmatprep.mubr.msk.f32.mxu0 %vm5505_vm0, %v5504_v0 }
 0x329   : > { %v1473_v30 = vpop.trf.xlu1 }
 0x32a   : > { %4562 = vmatmul.mubr.msk.f32.vlgmr.msra.gmra.mxu1 %vm1489_vm2, %v1473_v30  ;;  %v1047_v30 = vld [vmem:[#allocation10 + $0x18] sm:$0xff] }
 0x32b   : > { %4571 = vmatprep.mubr.msk.f32.mxu1 %vm5505_vm0, %v5504_v0 }
 0x3de   : > { %v1559_v34 = vpop.f32.mrf.mxu1 }
 0x3df   : > { %v1783_v35 = vsel %vm1782_vm3, -1e+09, %v1559_v34 }
 0x3e0   : > { %v4548_v36 = vpop.f32.mrf.mxu1  ;;  %v1787_v37 = vsel %vm1489_vm2, %v1783_v35, -inf }
 0x3e1   : > { %1788 = vmax.xlane.f32.xlu1 %v1787_v37 }
 0x3e2   : > { %v1632_v38 = vpop.f32.mrf.mxu1 }
 0x3e3   : > { %v1784_v39 = vsel %vm1782_vm3, -1e+09, %v1632_v38 }
 0x3e4   : > { %v4553_v40 = vpop.f32.mrf.mxu1  ;;  %v1790_v41 = vsel %vm1489_vm2, %v1784_v39, -inf }
 0x3e5   : > { %1791 = vmax.xlane.f32.xlu0 %v1790_v41 }
 0x3e6   : > { %v1705_v42 = vpop.f32.mrf.mxu0 }
 0x3e7   : > { %v1785_v43 = vsel %vm1782_vm3, -1e+09, %v1705_v42 }
 0x3e8   : > { %v4558_v44 = vpop.f32.mrf.mxu0  ;;  %v1793_v45 = vsel %vm1489_vm2, %v1785_v43, -inf }
 0x3e9   : > { %1794 = vmax.xlane.f32.xlu1 %v1793_v45 }
 0x3ea   : > { %v1778_v46 = vpop.f32.mrf.mxu1 }
 0x3eb   : > { %v1786_v47 = vsel %vm1782_vm3, -1e+09, %v1778_v46 }
 0x3ec   : > { %v1796_v48 = vsel %vm1489_vm2, %v1786_v47, -inf  ;;  %v4563_v49 = vpop.f32.mrf.mxu1 }
 0x3ed   : > { %1797 = vmax.xlane.f32.xlu1 %v1796_v48 }
 0x46a   : > { %v1789_v50 = vpop.xlane.xlu1 %1788 }
 0x46b   : > { %v1799_v51 = vsub.f32 %v1783_v35, %v1789_v50  ;;  %v1044_v35 = vld [vmem:[#allocation10] sm:$0xff] }
 0x46c   : > { %v2399_v50 = vld [vmem:[#allocation14 + $0x18] sm:$0xff] }
 0x46d   : > { %v1803_v52 = vmul.f32 1.442695, %v1799_v51  ;;  %v2398_v51 = vld [vmem:[#allocation14 + $0x10] sm:$0xff] }
 0x46e   : > { %v1792_v53 = vpop.xlane.xlu0 %1791 }
 0x46f   : > { %4897 = vpow2.f32 %v1803_v52  ;;  %v1800_v54 = vsub.f32 %v1784_v39, %v1792_v53  ;;  %v2397_v52 = vld [vmem:[#allocation14 + $0x8] sm:$0xff]  ;;  %v2403_v53 = vld [vmem:[#allocation16 + $0x18] sm:$0xff] }
 0x471   : > { %v1805_v55 = vmul.f32 1.442695, %v1800_v54  ;;  %v2402_v54 = vld [vmem:[#allocation16 + $0x10] sm:$0xff] }
 0x472   : > { %v1795_v56 = vpop.xlane.xlu1 %1794 }
 0x473   : > { %4899 = vpow2.f32 %v1805_v55  ;;  %v1801_v57 = vsub.f32 %v1785_v43, %v1795_v56  ;;  %v2401_v55 = vld [vmem:[#allocation16 + $0x8] sm:$0xff]  ;;  %v2400_v56 = vld [vmem:[#allocation16] sm:$0xff] }
 0x475   : > { %v1807_v58 = vmul.f32 1.442695, %v1801_v57  ;;  %v1029_v57 = vld [vmem:[%s876_s5] sm:$0xff]  ;;  %s6189_s5 = scalar_lea.vmem [#allocation29], %s4369_s18 }
 0x476   : > { %v1798_v59 = vpop.xlane.xlu1 %1797 }
 0x477   : > { %4901 = vpow2.f32 %v1807_v58  ;;  %v1802_v60 = vsub.f32 %v1786_v47, %v1798_v59 }
 0x479   : > { %v1809_v61 = vmul.f32 1.442695, %v1802_v60 }
 0x47b   : > { %4903 = vpow2.f32 %v1809_v61 }
 0x47c   : > { %v4898_v62 = vpop.eup %4897 }
 0x47d   : > { %v1811_v63 = vsel %vm1489_vm2, %v4898_v62, 0.0 }
 0x47e   : > { %1812 = vadd.xlane.f32.xlu1 %v1811_v63 }
 0x480   : > { %v4900_v1 = vpop.eup %4899 }
 0x481   : > { %v1814_v2 = vsel %vm1489_vm2, %v4900_v1, 0.0 }
 0x482   : > { %1815 = vadd.xlane.f32.xlu1 %v1814_v2 }
 0x484   : > { %v4902_v3 = vpop.eup %4901 }
 0x485   : > { %v1817_v4 = vsel %vm1489_vm2, %v4902_v3, 0.0 }
 0x486   : > { %1818 = vadd.xlane.f32.xlu1 %v1817_v4 }
 0x488   : > { %v4904_v6 = vpop.eup %4903 }
 0x489   : > { %v1820_v7 = vsel %vm1489_vm2, %v4904_v6, 0.0 }
 0x48a   : > { %1821 = vadd.xlane.f32.xlu0 %v1820_v7 }
 0x4b9   : > { %1329 = vxpose.xlu1.b32.start.end [1/1] (short) (narrow) %v1260_v31, 32  ;;  %v1046_v31 = vld [vmem:[#allocation10 + $0x10] sm:$0xff] }
 0x507   : > { %v1813_v8 = vpop.xlane.xlu1 %1812 }
 0x508   : > { %4905 = vrcp.f32 %v1813_v8 }
 0x50b   : > { %v1816_v9 = vpop.xlane.xlu1 %1815 }
 0x50c   : > { %4907 = vrcp.f32 %v1816_v9 }
 0x50f   : > { %v1819_v10 = vpop.xlane.xlu1 %1818 }
 0x510   : > { %4909 = vrcp.f32 %v1819_v10  ;;  %v2407_v10 = vld [vmem:[#allocation17 + $0x18] sm:$0xff] }
 0x513   : > { %v1822_v11 = vpop.xlane.xlu0 %1821 }
 0x514   : > { %4911 = vrcp.f32 %v1822_v11  ;;  %v2406_v11 = vld [vmem:[#allocation17 + $0x10] sm:$0xff] }
 0x515   : > { %v4906_v12 = vpop.eup %4905 }
 0x516   : > { %v1824_v13 = vmul.f32 %v4906_v12, %v4898_v62  ;;  %v4387_v62 = vld [vmem:[#allocation11] ss:$0 sm:$0xff] }
 0x518   : > { %3965 = vst.msk [vmem:[%s6088_s16] sm:$0xff] %vm1489_vm2, %v1824_v13 }
 0x519   : > { %v4908_v14 = vpop.eup %4907 }
 0x51a   : > { %v1826_v15 = vmul.f32 %v4908_v14, %v4900_v1  ;;  %v4388_v1 = vld [vmem:[#allocation13] ss:$0 sm:$0xff]  ;;  %v2404_v14 = vld [vmem:[#allocation17] sm:$0xff] }
 0x51c   : > { %3966 = vst.msk [vmem:[%s6088_s16 + $0x8] sm:$0xff] %vm1489_vm2, %v1826_v15 }
 0x51d   : > { %v4910_v16 = vpop.eup %4909 }
 0x51e   : > { %v1828_v17 = vmul.f32 %v4910_v16, %v4902_v3 }
 0x520   : > { %3967 = vst.msk [vmem:[%s6088_s16 + $0x10] sm:$0xff] %vm1489_vm2, %v1828_v17 }
 0x521   : > { %v4912_v18 = vpop.eup %4911 }
 0x522   : > { %v1830_v19 = vmul.f32 %v4912_v18, %v4904_v6 }
 0x524   : > { %3968 = vst.msk [vmem:[%s6088_s16 + $0x18] sm:$0xff] %vm1489_vm2, %v1830_v19 }
 0x535   : > { %v1345_v20 = vpop.trf.xlu1 }
 0x536   : > { %4565 = vmatpush3.xpose.msk.msra.mxu0 %vm1489_vm2, %v1345_v20 }
 0x537   : > { %4574 = vmatprep.subr.mxu0 %v5504_v0 }
 0x539   : > { %4567 = vmatmul.mubr.msk.f32.vlgmr.msra.gmra.mxu0 %vm1489_vm2, %v1824_v13  ;;  %v1346_v21 = vpop.trf.xlu1  ;;  %v2405_v13 = vld [vmem:[#allocation17 + $0x8] sm:$0xff] }
 0x53a   : > { %4570 = vmatpush3.xpose.msk.msra.mxu1 %vm1489_vm2, %v1346_v21  ;;  %4576 = vmatprep.mubr.msk.f32.mxu0 %vm5505_vm0, %v5504_v0 }
 0x53b   : > { %4579 = vmatprep.subr.mxu1 %v5504_v0 }
 0x53d   : > { %4572 = vmatmul.mubr.msk.f32.vlgmr.msra.gmra.mxu1 %vm1489_vm2, %v1826_v15  ;;  %v1347_v22 = vpop.trf.xlu1 }
 0x53e   : > { %4575 = vmatpush3.xpose.msk.msra.mxu0 %vm1489_vm2, %v1347_v22  ;;  %4581 = vmatprep.mubr.msk.f32.mxu1 %vm5505_vm0, %v5504_v0 }
 0x53f   : > { %4584 = vmatprep.subr.mxu0 %v5504_v0 }
 0x541   : > { %4577 = vmatmul.mubr.msk.f32.vlgmr.msra.gmra.mxu0 %vm1489_vm2, %v1828_v17  ;;  %v1348_v23 = vpop.trf.xlu1 }
 0x542   : > { %4580 = vmatpush3.xpose.msk.msra.mxu1 %vm1489_vm2, %v1348_v23  ;;  %4592 = vmatprep.mubr.msk.f32.mxu0 %vm5505_vm0, %v5504_v0 }
 0x543   : > { %4595 = vmatprep.subr.mxu1 %v5504_v0  ;;  %4585 = vmatpush3.msra.mxu0 %v1047_v30 }
 0x544   : > { %4586 = vmatprep.subr.mxu0 %v5504_v0 }
 0x545   : > { %4582 = vmatmul.mubr.msk.f32.vlgmr.msra.gmra.mxu1 %vm1489_vm2, %v1830_v19  ;;  %4587 = vmatpush3.msra.mxu0 %v1046_v31 }
 0x546   : > { %4603 = vmatprep.mubr.msk.f32.mxu1 %vm5505_vm0, %v5504_v0  ;;  %4588 = vmatprep.subr.mxu0 %v5504_v0 }
 0x547   : > { %4589 = vmatpush3.msra.mxu0 %v1045_v33  ;;  %4596 = vmatpush3.msra.mxu1 %v2399_v50 }
 0x548   : > { %4590 = vmatprep.subr.mxu0 %v5504_v0  ;;  %4597 = vmatprep.subr.mxu1 %v5504_v0 }
 0x549   : > { %4591 = vmatpush3.msra.mxu0 %v1044_v35  ;;  %4598 = vmatpush3.msra.mxu1 %v2398_v51 }
 0x54a   : > { %4606 = vmatprep.subr.mxu0 %v5504_v0  ;;  %4599 = vmatprep.subr.mxu1 %v5504_v0 }
 0x54b   : > { %4600 = vmatpush3.msra.mxu1 %v2397_v52 }
 0x54c   : > { %4601 = vmatprep.subr.mxu1 %v5504_v0 }
 0x5f9   : > { %v1903_v24 = vpop.f32.mrf.mxu0 }
 0x5fa   : > { %2135 = vxpose.xlu0.b32.start.end [1/1] (short) (narrow) %v1903_v24, 8 }
 0x5fb   : > { %v4568_v25 = vpop.f32.mrf.mxu0 }
 0x5fd   : > { %v1979_v26 = vpop.f32.mrf.mxu1 }
 0x5fe   : > { %2167 = vxpose.xlu0.b32.start.end [1/1] (short) (narrow) %v1979_v26, 8 }
 0x5ff   : > { %v4573_v27 = vpop.f32.mrf.mxu1 }
 0x601   : > { %v2055_v28 = vpop.f32.mrf.mxu0 }
 0x602   : > { %2199 = vxpose.xlu1.b32.start.end [1/1] (short) (narrow) %v2055_v28, 8  ;;  %v1031_v28 = vld [vmem:[%s894_s12] sm:$0xff] }
 0x603   : > { %v4578_v29 = vpop.f32.mrf.mxu0  ;;  %vm3147_vm4 = vcmp.eq.f32.partialorder %v1031_v28, 0.0  ;;  %v2409_v28 = vld [vmem:[#allocation19 + $0x8] sm:$0xff] }
 0x605   : > { %v2131_v32 = vpop.f32.mrf.mxu1 }
 0x606   : > { %2231 = vxpose.xlu0.b32.start.end [1/1] (short) (narrow) %v2131_v32, 8 }
 0x607   : > { %v4583_v34 = vpop.f32.mrf.mxu1 }
 0x676   : > { %v2151_v36 = vpop.trf.xlu0 }
 0x677   : > { %2263 = vxpose.xlu0.b32.start [1/4] (short) (narrow) %v2151_v36, 8 }
 0x67a   : > { %v2183_v37 = vpop.trf.xlu0 }
 0x67b   : > { %2264 = vxpose.xlu0.b32.cont [2/4] (short) (narrow) %v2183_v37, 8 }
 0x67e   : > { %v2215_v38 = vpop.trf.xlu1 }
 0x67f   : > { %2265 = vxpose.xlu0.b32.cont [3/4] (short) (narrow) %v2215_v38, 8 }
 0x682   : > { %v2247_v39 = vpop.trf.xlu0 }
 0x683   : > { %2266 = vxpose.xlu0.b32.end [4/4] (short) (narrow) %v2247_v39, 8 }
 0x6f3   : > { %v2279_v40 = vpop.trf.xlu0 }
 0x6f4   : > { %4593 = vmatmul.mubr.msk.f32.vlgmr.msra.gmra.mxu0 %vm1050_vm1, %v2279_v40 }
 0x6f5   : > { %4614 = vmatprep.mubr.msk.f32.mxu0 %vm5505_vm0, %v5504_v0  ;;  %4607 = vmatpush3.msra.mxu0 %v2403_v53 }
 0x6f6   : > { %4608 = vmatprep.subr.mxu0 %v5504_v0 }
 0x6f7   : > { %4609 = vmatpush3.msra.mxu0 %v2402_v54 }
 0x6f8   : > { %4610 = vmatprep.subr.mxu0 %v5504_v0 }
 0x6f9   : > { %4611 = vmatpush3.msra.mxu0 %v2401_v55 }
 0x6fa   : > { %4612 = vmatprep.subr.mxu0 %v5504_v0 }
 0x6fb   : > { %4613 = vmatpush3.msra.mxu0 %v2400_v56 }
 0x6fc   : > { %4615 = vmatmul.mubr.msk.f32.vlgmr.msra.gmra.mxu0 %vm1050_vm1, %v1029_v57  ;;  %4628 = vmatprep.subr.mxu0 %v5504_v0 }
 0x6fd   : > { %4630 = vmatprep.mubr.msk.f32.mxu0 %vm5505_vm0, %v5504_v0 }
 0x7b4   : > { %v2364_v41 = vpop.f32.mrf.mxu0 }
 0x7b5   : > { %v2365_v42 = vadd.f32 %v2364_v41, %v6007_v5  ;;  %v2396_v5 = vld [vmem:[#allocation14] sm:$0xff] }
 0x7b6   : > { %v4594_v43 = vpop.f32.mrf.mxu0  ;;  %4602 = vmatpush3.msra.mxu1 %v2396_v5 }
 0x7b7   : > { %v2368_v44 = vsel %vm1050_vm1, %v2365_v42, 0.0  ;;  %4617 = vmatprep.subr.mxu1 %v5504_v0 }
 0x7b8   : > { %2369 = vadd.xlane.f32.xlu1 %v2368_v44 }
 0x7bc   : > { %v2556_v4 = vpop.f32.mrf.mxu0 }
 0x7be   : > { %v4616_v6 = vpop.f32.mrf.mxu0 }
 0x841   : > { %v2370_v45 = vpop.xlane.xlu1 %2369 }
 0x842   : > { %v2372_v46 = vmul.f32 0.03125, %v2370_v45 }
 0x844   : > { %v2373_v47 = vsub.f32 %v2365_v42, %v2372_v46 }
 0x846   : > { %v2374_v48 = vmul.f32 %v2373_v47, %v2373_v47 }
 0x848   : > { %v2375_v49 = vsel %vm1050_vm1, %v2374_v48, 0.0 }
 0x849   : > { %2376 = vadd.xlane.f32.xlu0 %v2375_v49 }
 0x876   : > { %2663 = vxpose.xlu0.b32.start.end [1/1] (short) (narrow) %v2556_v4, 32 }
 0x8d2   : > { %v2377_v58 = vpop.xlane.xlu0 %2376 }
 0x8d3   : > { %v2378_v59 = vmul.f32 0.03125, %v2377_v58 }
 0x8d5   : > { %v2379_v60 = vadd.f32 1e-06, %v2378_v59 }
 0x8d7   : > { %4913 = vrsqrt.f32 %v2379_v60 }
 0x8e4   : > { %v4914_v61 = vpop.eup %4913 }
 0x8e5   : > { %v2381_v63 = vmul.f32 %v4914_v61, %v2373_v47 }
 0x8e7   : > { %v2388_v2 = vmul.f32 %v4387_v62, %v2381_v63 }
 0x8e9   : > { %v6141_v3 = vadd.f32 %v4388_v1, %v2388_v2 }
 0x8eb   : > { %4604 = vmatmul.mubr.msk.f32.vlgmr.msra.gmra.mxu1 %vm1050_vm1, %v6141_v3 }
 0x8ec   : > { %4625 = vmatprep.mubr.msk.f32.mxu1 %vm5505_vm0, %v5504_v0  ;;  %4618 = vmatpush3.msra.mxu1 %v2407_v10 }
 0x8ed   : > { %4619 = vmatprep.subr.mxu1 %v5504_v0 }
 0x8ee   : > { %4620 = vmatpush3.msra.mxu1 %v2406_v11 }
 0x8ef   : > { %4621 = vmatprep.subr.mxu1 %v5504_v0 }
 0x8f0   : > { %4622 = vmatpush3.msra.mxu1 %v2405_v13 }
 0x8f1   : > { %4623 = vmatprep.subr.mxu1 %v5504_v0 }
 0x8f2   : > { %v2679_v12 = vpop.trf.xlu0  ;;  %4624 = vmatpush3.msra.mxu1 %v2404_v14 }
 0x8f3   : > { %4629 = vmatpush3.msra.mxu0 %v2679_v12  ;;  %4633 = vmatprep.subr.mxu1 %v5504_v0 }
 0x8f4   : > { %4638 = vmatprep.subr.mxu0 %v5504_v0  ;;  %4626 = vmatmul.mubr.msk.f32.vlgmr.msra.gmra.mxu1 %vm1050_vm1, %v1029_v57 }
 0x8f5   : > { %4635 = vmatprep.mubr.msk.f32.mxu1 %vm5505_vm0, %v5504_v0 }
 0x8f6   : > { %v2680_v15 = vpop.trf.xlu0 }
 0x8f7   : > { %4634 = vmatpush3.msra.mxu1 %v2680_v15 }
 0x8f8   : > { %4643 = vmatprep.subr.mxu1 %v5504_v0 }
 0x8fa   : > { %v2681_v22 = vpop.trf.xlu0 }
 0x8fe   : > { %v2682_v23 = vpop.trf.xlu0 }
 0x9ab   : > { %v2483_v7 = vpop.f32.mrf.mxu1 }
 0x9ac   : > { %v2630_v8 = vmul.f32 0.35355338, %v2483_v7 }
 0x9ad   : > { %v4605_v9 = vpop.f32.mrf.mxu1 }
 0x9ae   : > { %2631 = vxpose.xlu1.b32.start.end [1/1] (short) (narrow) %v2630_v8, 32 }
 0x9b4   : > { %v6156_v20 = vpop.f32.mrf.mxu1 }
 0x9b6   : > { %v4627_v21 = vpop.f32.mrf.mxu1 }
 0xa2a   : > { %v2647_v16 = vpop.trf.xlu1 }
 0xa2b   : > { %2727 = vxpose.xlu1.b32.start.end [1/1] (short) (narrow) %v2647_v16, 8 }
 0xa2e   : > { %v2648_v17 = vpop.trf.xlu1 }
 0xa2f   : > { %2759 = vxpose.xlu0.b32.start.end [1/1] (short) (narrow) %v2648_v17, 8 }
 0xa32   : > { %v2649_v18 = vpop.trf.xlu1 }
 0xa33   : > { %2791 = vxpose.xlu1.b32.start.end [1/1] (short) (narrow) %v2649_v18, 8 }
 0xa36   : > { %v2650_v19 = vpop.trf.xlu1 }
 0xa37   : > { %2823 = vxpose.xlu1.b32.start.end [1/1] (short) (narrow) %v2650_v19, 8 }
 0xaa7   : > { %v2743_v24 = vpop.trf.xlu1 }
 0xaa8   : > { %4631 = vmatmul.mubr.msk.f32.vlgmr.msra.gmra.mxu0 %vm1489_vm2, %v2743_v24 }
 0xaa9   : > { %4639 = vmatpush3.msra.mxu0 %v2681_v22  ;;  %4640 = vmatprep.mubr.msk.f32.mxu0 %vm5505_vm0, %v5504_v0 }
 0xaaa   : > { %4648 = vmatprep.subr.mxu0 %v5504_v0 }
 0xaab   : > { %v2775_v25 = vpop.trf.xlu0 }
 0xaac   : > { %4636 = vmatmul.mubr.msk.f32.vlgmr.msra.gmra.mxu1 %vm1489_vm2, %v2775_v25  ;;  %v2411_v25 = vld [vmem:[#allocation19 + $0x18] sm:$0xff] }
 0xaad   : > { %4644 = vmatpush3.msra.mxu1 %v2682_v23  ;;  %4645 = vmatprep.mubr.msk.f32.mxu1 %vm5505_vm0, %v5504_v0 }
 0xaae   : > { %4653 = vmatprep.subr.mxu1 %v5504_v0 }
 0xaaf   : > { %v2807_v26 = vpop.trf.xlu1 }
 0xab0   : > { %4641 = vmatmul.mubr.msk.f32.vlgmr.msra.gmra.mxu0 %vm1489_vm2, %v2807_v26  ;;  %v2410_v26 = vld [vmem:[#allocation19 + $0x10] sm:$0xff] }
 0xab1   : > { %4650 = vmatprep.mubr.msk.f32.mxu0 %vm5505_vm0, %v5504_v0 }
 0xab3   : > { %v2839_v27 = vpop.trf.xlu1 }
 0xab4   : > { %4646 = vmatmul.mubr.msk.f32.vlgmr.msra.gmra.mxu1 %vm1489_vm2, %v2839_v27 }
 0xab5   : > { %4655 = vmatprep.mubr.msk.f32.mxu1 %vm5505_vm0, %v5504_v0 }
 0xb68   : > { %v2924_v29 = vpop.f32.mrf.mxu0 }
 0xb69   : > { %v3148_v30 = vsel %vm3147_vm4, -1e+09, %v2924_v29 }
 0xb6a   : > { %v3152_v31 = vsel %vm1489_vm2, %v3148_v30, -inf  ;;  %v4632_v32 = vpop.f32.mrf.mxu0 }
 0xb6b   : > { %3153 = vmax.xlane.f32.xlu0 %v3152_v31 }
 0xb6c   : > { %v2997_v33 = vpop.f32.mrf.mxu1 }
 0xb6d   : > { %v3149_v34 = vsel %vm3147_vm4, -1e+09, %v2997_v33 }
 0xb6e   : > { %v4637_v35 = vpop.f32.mrf.mxu1  ;;  %v3155_v36 = vsel %vm1489_vm2, %v3149_v34, -inf }
 0xb6f   : > { %3156 = vmax.xlane.f32.xlu1 %v3155_v36 }
 0xb70   : > { %v3070_v37 = vpop.f32.mrf.mxu0 }
 0xb71   : > { %v3150_v38 = vsel %vm3147_vm4, -1e+09, %v3070_v37 }
 0xb72   : > { %v4642_v39 = vpop.f32.mrf.mxu0  ;;  %v3158_v40 = vsel %vm1489_vm2, %v3150_v38, -inf }
 0xb73   : > { %3159 = vmax.xlane.f32.xlu1 %v3158_v40 }
 0xb74   : > { %v3143_v41 = vpop.f32.mrf.mxu1 }
 0xb75   : > { %v3151_v42 = vsel %vm3147_vm4, -1e+09, %v3143_v41 }
 0xb76   : > { %v3161_v43 = vsel %vm1489_vm2, %v3151_v42, -inf  ;;  %v4647_v44 = vpop.f32.mrf.mxu1 }
 0xb77   : > { %3162 = vmax.xlane.f32.xlu1 %v3161_v43 }
 0xbf4   : > { %v3154_v45 = vpop.xlane.xlu0 %3153 }
 0xbf5   : > { %v3164_v46 = vsub.f32 %v3148_v30, %v3154_v45  ;;  %v2408_v30 = vld [vmem:[#allocation19] sm:$0xff] }
 0xbf6   : > { %v3763_v45 = vld [vmem:[#allocation23 + $0x18] sm:$0xff] }
 0xbf7   : > { %v3168_v47 = vmul.f32 1.442695, %v3164_v46  ;;  %v3762_v46 = vld [vmem:[#allocation23 + $0x10] sm:$0xff] }
 0xbf8   : > { %v3157_v48 = vpop.xlane.xlu1 %3156 }
 0xbf9   : > { %4915 = vpow2.f32 %v3168_v47  ;;  %v3165_v49 = vsub.f32 %v3149_v34, %v3157_v48  ;;  %v3761_v47 = vld [vmem:[#allocation23 + $0x8] sm:$0xff]  ;;  %v3852_v48 = vld [vmem:[%s6524_s6 + $0x38] sm:$0xff] }
 0xbfb   : > { %v3170_v50 = vmul.f32 1.442695, %v3165_v49  ;;  %v3851_v49 = vld [vmem:[%s6524_s6 + $0x30] sm:$0xff] }
 0xbfc   : > { %v3160_v51 = vpop.xlane.xlu1 %3159 }
 0xbfd   : > { %4917 = vpow2.f32 %v3170_v50  ;;  %v3166_v52 = vsub.f32 %v3150_v38, %v3160_v51  ;;  %v3850_v50 = vld [vmem:[%s6524_s6 + $0x28] sm:$0xff]  ;;  %v3849_v51 = vld [vmem:[%s6524_s6 + $0x20] sm:$0xff] }
 0xbff   : > { %v3172_v5 = vmul.f32 1.442695, %v3166_v52  ;;  %v3848_v52 = vld [vmem:[%s6524_s6 + $0x18] sm:$0xff] }
 0xc00   : > { %v3163_v53 = vpop.xlane.xlu1 %3162 }
 0xc01   : > { %4919 = vpow2.f32 %v3172_v5  ;;  %v3167_v54 = vsub.f32 %v3151_v42, %v3163_v53 }
 0xc03   : > { %v3174_v55 = vmul.f32 1.442695, %v3167_v54 }
 0xc05   : > { %4921 = vpow2.f32 %v3174_v55 }
 0xc06   : > { %v4916_v56 = vpop.eup %4915 }
 0xc07   : > { %v3176_v57 = vsel %vm1489_vm2, %v4916_v56, 0.0 }
 0xc08   : > { %3177 = vadd.xlane.f32.xlu0 %v3176_v57 }
 0xc0a   : > { %v4918_v58 = vpop.eup %4917 }
 0xc0b   : > { %v3179_v59 = vsel %vm1489_vm2, %v4918_v58, 0.0 }
 0xc0c   : > { %3180 = vadd.xlane.f32.xlu1 %v3179_v59 }
 0xc0e   : > { %v4920_v60 = vpop.eup %4919 }
 0xc0f   : > { %v3182_v61 = vsel %vm1489_vm2, %v4920_v60, 0.0 }
 0xc10   : > { %3183 = vadd.xlane.f32.xlu0 %v3182_v61  ;;  %v3847_v61 = vld [vmem:[%s6524_s6 + $0x10] sm:$0xff] }
 0xc12   : > { %v4922_v62 = vpop.eup %4921 }
 0xc13   : > { %v3185_v63 = vsel %vm1489_vm2, %v4922_v62, 0.0 }
 0xc14   : > { %3186 = vadd.xlane.f32.xlu1 %v3185_v63  ;;  %v3845_v63 = vld [vmem:[%s6524_s6] sm:$0xff] }
 0xc3d   : > { %2695 = vxpose.xlu0.b32.start.end [1/1] (short) (narrow) %v6156_v20, 32 }
 0xc91   : > { %v3178_v1 = vpop.xlane.xlu0 %3177 }
 0xc92   : > { %4923 = vrcp.f32 %v3178_v1  ;;  %v4407_v1 = vld [vmem:[#allocation25] ss:$0 sm:$0xff] }
 0xc95   : > { %v3181_v2 = vpop.xlane.xlu1 %3180 }
 0xc96   : > { %4925 = vrcp.f32 %v3181_v2 }
 0xc99   : > { %v3184_v4 = vpop.xlane.xlu0 %3183 }
 0xc9a   : > { %4927 = vrcp.f32 %v3184_v4 }
 0xc9d   : > { %v3187_v6 = vpop.xlane.xlu1 %3186 }
 0xc9e   : > { %4929 = vrcp.f32 %v3187_v6 }
 0xc9f   : > { %v4924_v7 = vpop.eup %4923 }
 0xca0   : > { %v3189_v8 = vmul.f32 %v4924_v7, %v4916_v56  ;;  %v4405_v56 = vld [vmem:[#allocation20] ss:$0 sm:$0xff] }
 0xca2   : > { %3969 = vst.msk [vmem:[%s6189_s5] sm:$0xff] %vm1489_vm2, %v3189_v8 }
 0xca3   : > { %v4926_v9 = vpop.eup %4925 }
 0xca4   : > { %v3191_v10 = vmul.f32 %v4926_v9, %v4918_v58  ;;  %v4406_v58 = vld [vmem:[#allocation22] ss:$0 sm:$0xff] }
 0xca6   : > { %3970 = vst.msk [vmem:[%s6189_s5 + $0x8] sm:$0xff] %vm1489_vm2, %v3191_v10 }
 0xca7   : > { %v4928_v11 = vpop.eup %4927 }
 0xca8   : > { %v3193_v12 = vmul.f32 %v4928_v11, %v4920_v60 }
 0xcaa   : > { %3971 = vst.msk [vmem:[%s6189_s5 + $0x10] sm:$0xff] %vm1489_vm2, %v3193_v12 }
 0xcab   : > { %v4930_v13 = vpop.eup %4929 }
 0xcac   : > { %v3195_v14 = vmul.f32 %v4930_v13, %v4922_v62  ;;  %v3846_v62 = vld [vmem:[%s6524_s6 + $0x8] sm:$0xff] }
 0xcae   : > { %3972 = vst.msk [vmem:[%s6189_s5 + $0x18] sm:$0xff] %vm1489_vm2, %v3195_v14 }
 0xcb9   : > { %v2711_v15 = vpop.trf.xlu0 }
 0xcba   : > { %4649 = vmatpush3.xpose.msk.msra.mxu0 %vm1489_vm2, %v2711_v15 }
 0xcbb   : > { %4658 = vmatprep.subr.mxu0 %v5504_v0 }
 0xcbd   : > { %4651 = vmatmul.mubr.msk.f32.vlgmr.msra.gmra.mxu0 %vm1489_vm2, %v3189_v8  ;;  %v2712_v16 = vpop.trf.xlu0  ;;  %v4409_v8 = vld [vmem:[%s6525_s3] ss:$0 sm:$0xff]  ;;  %s5337_s3 = sshll.u32 %s5506_s4, 4  ;;  %s5338_s3 = int_to_ptr.vmem [resolvable:$false] %s5337_s3 }
 0xcbe   : > { %4654 = vmatpush3.xpose.msk.msra.mxu1 %vm1489_vm2, %v2712_v16  ;;  %4660 = vmatprep.mubr.msk.f32.mxu0 %vm5505_vm0, %v5504_v0  ;;  %s5339_s1 = scalar_lea.vmem %s5338_s3, 1024  ;;  %p5340_p6 = scmp.lt.s32.totalorder %s6282_s30, %s5338_s3 }
 0xcbf   : > { %4663 = vmatprep.subr.mxu1 %v5504_v0  ;;  %p5341_p7 = scmp.lt.s32.totalorder %s5339_s1, %s5333_s9 }
 0xcc1   : > { %v2713_v17 = vpop.trf.xlu0  ;;  %4656 = vmatmul.mubr.msk.f32.vlgmr.msra.gmra.mxu1 %vm1489_vm2, %v3191_v10  ;;  %p5342_p9 = por %p5341_p7, %p5340_p6 }
 0xcc2   : > { %4659 = vmatpush3.xpose.msk.msra.mxu0 %vm1489_vm2, %v2713_v17  ;;  %4665 = vmatprep.mubr.msk.f32.mxu1 %vm5505_vm0, %v5504_v0 }
 0xcc3   : > { %4668 = vmatprep.subr.mxu0 %v5504_v0  ;;  %p5343_p12 = pnand %p5342_p9, %p5336_p8 }
 0xcc5   : > { %4661 = vmatmul.mubr.msk.f32.vlgmr.msra.gmra.mxu0 %vm1489_vm2, %v3193_v12  ;;  %v2714_v18 = vpop.trf.xlu0 }
 0xcc6   : > { %4664 = vmatpush3.xpose.msk.msra.mxu1 %vm1489_vm2, %v2714_v18  ;;  %4676 = vmatprep.mubr.msk.f32.mxu0 %vm5505_vm0, %v5504_v0 }
 0xcc7   : > { %4679 = vmatprep.subr.mxu1 %v5504_v0  ;;  %4669 = vmatpush3.msra.mxu0 %v2411_v25 }
 0xcc8   : > { %4670 = vmatprep.subr.mxu0 %v5504_v0 }
 0xcc9   : > { %4666 = vmatmul.mubr.msk.f32.vlgmr.msra.gmra.mxu1 %vm1489_vm2, %v3195_v14  ;;  %4671 = vmatpush3.msra.mxu0 %v2410_v26 }
 0xcca   : > { %4687 = vmatprep.mubr.msk.f32.mxu1 %vm5505_vm0, %v5504_v0  ;;  %4672 = vmatprep.subr.mxu0 %v5504_v0 }
 0xccb   : > { %4673 = vmatpush3.msra.mxu0 %v2409_v28  ;;  %4680 = vmatpush3.msra.mxu1 %v3763_v45 }
 0xccc   : > { %4674 = vmatprep.subr.mxu0 %v5504_v0  ;;  %4681 = vmatprep.subr.mxu1 %v5504_v0 }
 0xccd   : > { %4675 = vmatpush3.msra.mxu0 %v2408_v30  ;;  %4682 = vmatpush3.msra.mxu1 %v3762_v46 }
 0xcce   : > { %4690 = vmatprep.subr.mxu0 %v5504_v0  ;;  %4683 = vmatprep.subr.mxu1 %v5504_v0 }
 0xccf   : > { %4684 = vmatpush3.msra.mxu1 %v3761_v47 }
 0xcd0   : > { %4685 = vmatprep.subr.mxu1 %v5504_v0 }
 0xd7d   : > { %v3268_v19 = vpop.f32.mrf.mxu0 }
 0xd7e   : > { %3500 = vxpose.xlu1.b32.start.end [1/1] (short) (narrow) %v3268_v19, 8 }
 0xd7f   : > { %v4652_v20 = vpop.f32.mrf.mxu0 }
 0xd81   : > { %v3344_v21 = vpop.f32.mrf.mxu1 }
 0xd82   : > { %3532 = vxpose.xlu0.b32.start.end [1/1] (short) (narrow) %v3344_v21, 8 }
 0xd83   : > { %v4657_v22 = vpop.f32.mrf.mxu1 }
 0xd85   : > { %v3420_v23 = vpop.f32.mrf.mxu0 }
 0xd86   : > { %3564 = vxpose.xlu1.b32.start.end [1/1] (short) (narrow) %v3420_v23, 8 }
 0xd87   : > { %v4662_v24 = vpop.f32.mrf.mxu0 }
 0xd89   : > { %v3496_v27 = vpop.f32.mrf.mxu1 }
 0xd8a   : > { %3596 = vxpose.xlu1.b32.start.end [1/1] (short) (narrow) %v3496_v27, 8 }
 0xd8b   : > { %v4667_v29 = vpop.f32.mrf.mxu1 }
 0xdfa   : > { %v3516_v31 = vpop.trf.xlu1 }
 0xdfb   : > { %3628 = vxpose.xlu0.b32.start [1/4] (short) (narrow) %v3516_v31, 8 }
 0xdfe   : > { %v3548_v32 = vpop.trf.xlu0 }
 0xdff   : > { %3629 = vxpose.xlu0.b32.cont [2/4] (short) (narrow) %v3548_v32, 8 }
 0xe02   : > { %v3580_v33 = vpop.trf.xlu1 }
 0xe03   : > { %3630 = vxpose.xlu0.b32.cont [3/4] (short) (narrow) %v3580_v33, 8 }
 0xe06   : > { %v3612_v34 = vpop.trf.xlu1 }
 0xe07   : > { %3631 = vxpose.xlu0.b32.end [4/4] (short) (narrow) %v3612_v34, 8 }
 0xe77   : > { %v3644_v35 = vpop.trf.xlu0 }
 0xe78   : > { %4677 = vmatmul.mubr.msk.f32.vlgmr.msra.gmra.mxu0 %vm1050_vm1, %v3644_v35 }
 0xe79   : > { %4706 = vmatprep.mubr.msk.f32.mxu0 %vm5505_vm0, %v5504_v0  ;;  %4691 = vmatpush3.msra.mxu0 %v3852_v48 }
 0xe7a   : > { %4692 = vmatprep.subr.mxu0 %v5504_v0 }
 0xe7b   : > { %4693 = vmatpush3.msra.mxu0 %v3851_v49 }
 0xe7c   : > { %4694 = vmatprep.subr.mxu0 %v5504_v0 }
 0xe7d   : > { %4695 = vmatpush3.msra.mxu0 %v3850_v50 }
 0xe7e   : > { %4696 = vmatprep.subr.mxu0 %v5504_v0 }
 0xe7f   : > { %4697 = vmatpush3.msra.mxu0 %v3849_v51 }
 0xe80   : > { %4698 = vmatprep.subr.mxu0 %v5504_v0 }
 0xe81   : > { %4699 = vmatpush3.msra.mxu0 %v3848_v52 }
 0xe82   : > { %4700 = vmatprep.subr.mxu0 %v5504_v0 }
 0xe83   : > { %4701 = vmatpush3.msra.mxu0 %v3847_v61 }
 0xe84   : > { %4702 = vmatprep.subr.mxu0 %v5504_v0 }
 0xe85   : > { %4703 = vmatpush3.msra.mxu0 %v3846_v62 }
 0xe86   : > { %4704 = vmatprep.subr.mxu0 %v5504_v0 }
 0xe87   : > { %4705 = vmatpush3.msra.mxu0 %v3845_v63 }
 0xf38   : > { %v3729_v36 = vpop.f32.mrf.mxu0 }
 0xf39   : > { %v3730_v37 = vadd.f32 %v3729_v36, %v6141_v3  ;;  %v3760_v3 = vld [vmem:[#allocation23] sm:$0xff] }
 0xf3a   : > { %v4678_v38 = vpop.f32.mrf.mxu0  ;;  %4686 = vmatpush3.msra.mxu1 %v3760_v3 }
 0xf3b   : > { %v3733_v39 = vsel %vm1050_vm1, %v3730_v37, 0.0 }
 0xf3c   : > { %3734 = vadd.xlane.f32.xlu1 %v3733_v39 }
 0xfc5   : > { %v3735_v40 = vpop.xlane.xlu1 %3734 }
 0xfc6   : > { %v3736_v41 = vmul.f32 0.03125, %v3735_v40 }
 0xfc8   : > { %v3737_v42 = vsub.f32 %v3730_v37, %v3736_v41 }
 0xfca   : > { %v3738_v43 = vmul.f32 %v3737_v42, %v3737_v42 }
 0xfcc   : > { %v3739_v44 = vsel %vm1050_vm1, %v3738_v43, 0.0 }
 0xfcd   : > { %3740 = vadd.xlane.f32.xlu0 %v3739_v44 }
0x1056   : > { %v3741_v5 = vpop.xlane.xlu0 %3740 }
0x1057   : > { %v3742_v53 = vmul.f32 0.03125, %v3741_v5 }
0x1059   : > { %v3743_v54 = vadd.f32 1e-06, %v3742_v53 }
0x105b   : > { %4931 = vrsqrt.f32 %v3743_v54 }
0x1068   : > { %v4932_v55 = vpop.eup %4931 }
0x1069   : > { %v3745_v57 = vmul.f32 %v4932_v55, %v3737_v42 }
0x106b   : > { %v3752_v59 = vmul.f32 %v4405_v56, %v3745_v57 }
0x106d   : > { %v3759_v60 = vadd.f32 %v4406_v58, %v3752_v59 }
0x106f   : > { %4688 = vmatmul.mubr.msk.f32.vlgmr.msra.gmra.mxu1 %vm1050_vm1, %v3759_v60 }
0x112f   : > { %v3840_v2 = vpop.f32.mrf.mxu1 }
0x1130   : > { %v3841_v4 = vadd.f32 %v4407_v1, %v3840_v2 }
0x1131   : > { %v4689_v6 = vpop.f32.mrf.mxu1 }
0x1132   : > { %v3844_v7 = vmax.f32 %v3841_v4, 0.0 }
0x1134   : > { %4707 = vmatmul.mubr.msk.f32.vlgmr.msra.gmra.mxu0 %vm3860_vm5, %v3844_v7 }
0x11f4   : > { %v3930_v9 = vpop.f32.mrf.mxu0 }
0x11f5   : > { %v3931_v10 = vadd.f32 %v4409_v8, %v3930_v9 }
0x11f6   : > { %v4708_v11 = vpop.f32.mrf.mxu0 }
0x11f7   : > { %v3934_v0 = vadd.f32 %v3931_v10, %v3759_v60 }
0x11f9   : > { %v3937_v12 = vsel %vm1050_vm1, %v3934_v0, 0.0 }
0x11fa   : > { %3938 = vadd.xlane.f32.xlu1 %v3937_v12 }
0x1283   : > { %v3939_v13 = vpop.xlane.xlu1 %3938 }
0x1284   : > { %v3940_v14 = vmul.f32 0.03125, %v3939_v13 }
0x1286   : > { %v6268_v15 = vsub.f32 %v3934_v0, %v3940_v14 }
0x1288   : > { %v3942_v16 = vmul.f32 %v6268_v15, %v6268_v15 }
0x128a   : > { %v3943_v17 = vsel %vm1050_vm1, %v3942_v16, 0.0 }
0x128b   : > { %3944 = vadd.xlane.f32.xlu1 %v3943_v17 }
0x128c   : > { %5346 = shalt.err (!%p5343_p12)
}
0x128d   : > { %s5347_s16 = scalar_lea.hbm %s6279_s2, 512  ;;  %s5351_s4 = scalar_lea.hbm %s6527_s8, 1024 }
0x128e   : > { %p5348_p13 = scmp.ne.s32.totalorder %s6279_s2, %s5347_s16  ;;  %p5352_p10 = scmp.lt.s32.totalorder %s6279_s2, %s6527_s8 }
0x128f   : > { %p5353_p5 = scmp.lt.s32.totalorder %s5351_s4, %s5347_s16 }
0x1290   : > { %p5349_p3 = pnand %p5348_p13, %p6528_p2 }
0x1291   : > { %p5354_p4 = por %p5353_p5, %p5352_p10 }
0x1292   : > { %p5350_p11 = pneg %p5349_p3 }
0x1294   : > { %p5355_p0 = pnand %p5354_p4, %p5350_p11 }
0x1296   : > { %5358 = shalt.err (!%p5355_p0)
}
0x1297   : > { %s5507_s1 = smov 128   ;;  %s5508_s9 = smov 8  }
0x1298   : > { %s6529_s3 = scalar_lea.sflag [#allocation28], %s5946_s0  ;;  %s6530_s19 = sshll.u32 %s5657_s29, 9 }
0x1299   : > { %4762 = dma.vmem_to_hbm [thread:$0]  (%p6528_p2), %s6282_s30, 512, %s6279_s2, %s6529_s3, %s5507_s1, %s5507_s1, %s5508_s9  }
0x129a   : > { %s6531_s18 = sld [smem:[#allocation67_spill]]  ;;  %s4026_s4 = sshll.u32 %s6189_s5, 4  ;;  %s4027_s4 = int_to_ptr.vmem [resolvable:$true] %s4026_s4 }
0x129b   : > { %s5359_s6 = scalar_lea.vmem %s4027_s4, 512  ;;  %s5509_s8 = smov [#allocation29]  }
0x129c   : > { %p5360_p1 = scmp.ne.s32.totalorder %s4027_s4, %s5359_s6  ;;  %s5363_s10 = sshll.u32 %s5509_s8, 4  ;;  %s5364_s10 = int_to_ptr.vmem [resolvable:$false] %s5363_s10 }
0x129d   : > { %s5365_s11 = scalar_lea.vmem %s5364_s10, 1024  ;;  %p5366_p7 = scmp.lt.s32.totalorder %s4027_s4, %s5364_s10 }
0x129e   : > { %p5361_p8 = pnand %p5360_p1, %p6528_p2  ;;  %p5367_p9 = scmp.lt.s32.totalorder %s5365_s11, %s5359_s6 }
0x12a0   : > { %s6315_s12 = scalar_lea.hbm %s6531_s18, %s6530_s19  ;;  %p5362_p6 = pneg %p5361_p8 }
0x12a1   : > { %p5368_p12 = por %p5367_p9, %p5366_p7 }
0x12a3   : > { %p5369_p13 = pnand %p5368_p12, %p5362_p6 }
0x12a5   : > { %5372 = shalt.err (!%p5369_p13)
}
0x12a6   : > { %s5373_s5 = scalar_lea.hbm %s6315_s12, 512  ;;  %s5377_s8 = scalar_lea.hbm %s6531_s18, 1024 }
0x12a7   : > { %p5374_p3 = scmp.ne.s32.totalorder %s6315_s12, %s5373_s5  ;;  %p5378_p5 = scmp.lt.s32.totalorder %s6315_s12, %s6531_s18 }
0x12a8   : > { %p5379_p4 = scmp.lt.s32.totalorder %s5377_s8, %s5373_s5 }
0x12a9   : > { %p5375_p11 = pnand %p5374_p3, %p6528_p2 }
0x12aa   : > { %p5380_p0 = por %p5379_p4, %p5378_p5 }
0x12ab   : > { %p5376_p10 = pneg %p5375_p11 }
0x12ad   : > { %p5381_p1 = pnand %p5380_p0, %p5376_p10 }
0x12af   : > { %5384 = shalt.err (!%p5381_p1)
}
0x12b0   : > { %s6532_s11 = scalar_lea.sflag [#allocation28], %s5946_s0  ;;  %s6533_s23 = sld [smem:[#allocation63_spill]] }
0x12b1   : > { %4763 = dma.vmem_to_hbm [thread:$0]  (%p6528_p2), %s4027_s4, 512, %s6315_s12, %s6532_s11, %s5507_s1, %s5507_s1, %s5508_s9  }
0x12b2   : > { %s6534_s0 = sld [smem:[#allocation64_spill]]  ;;  %s4416_s2 = sshll.u32 %s5657_s29, 7 }
0x12b3   : > { %s1013_s30 = scalar_lea.vmem [#allocation26], %s5937_s7  ;;  %s6535_s4 = sld [smem:[#allocation65_spill]] }
0x12b4   : > { %s3997_s1 = sshll.u32 %s1013_s30, 4  ;;  %s3974_s3 = scalar_lea.sflag [#allocation4], %s5934_s20  ;;  %s3998_s1 = int_to_ptr.vmem [resolvable:$true] %s3997_s1 }
0x12b5   : > { %s5385_s19 = scalar_lea.vmem %s3998_s1, 128  ;;  %s5510_s11 = smov [#allocation26]  }
0x12b6   : > { %v4411_v22 = vld [vmem:[%s6533_s23] ss:$0 sm:$0xff]  ;;  %p5386_p8 = scmp.ne.s32.totalorder %s3998_s1, %s5385_s19  ;;  %s5389_s10 = sshll.u32 %s5510_s11, 4  ;;  %s5390_s10 = int_to_ptr.vmem [resolvable:$false] %s5389_s10 }
0x12b7   : > { %s5391_s29 = scalar_lea.vmem %s5390_s10, 256  ;;  %p5392_p9 = scmp.lt.s32.totalorder %s3998_s1, %s5390_s10 }
0x12b8   : > { %v4412_v24 = vld [vmem:[%s6534_s0] ss:$0 sm:$0xff]  ;;  %p5387_p6 = pnand %p5386_p8, %p6528_p2  ;;  %p5393_p12 = scmp.lt.s32.totalorder %s5391_s29, %s5385_s19 }
0x12b9   : > { %s3995_s8 = scalar_lea.hbm %s6535_s4, %s4416_s2 }
0x12ba   : > { %p5388_p7 = pneg %p5387_p6  ;;  %p5394_p13 = por %p5393_p12, %p5392_p9 }
0x12bc   : > { %p5395_p3 = pnand %p5394_p13, %p5388_p7 }
0x1314   : > { %v3945_v18 = vpop.xlane.xlu1 %3944 }
0x1315   : > { %v3946_v19 = vmul.f32 0.03125, %v3945_v18 }
0x1317   : > { %v3947_v20 = vadd.f32 1e-06, %v3946_v19 }
0x1319   : > { %4933 = vrsqrt.f32 %v3947_v20 }
0x1326   : > { %v4934_v21 = vpop.eup %4933 }
0x1327   : > { %v3949_v23 = vmul.f32 %v4934_v21, %v6268_v15 }
0x1329   : > { %v3956_v25 = vmul.f32 %v4411_v22, %v3949_v23 }
0x132b   : > { %v3963_v26 = vadd.f32 %v4412_v24, %v3956_v25 }
0x132d   : > { %3964 = vst.msk [vmem:[%s1013_s30] sm:$0xff] %vm1050_vm1, %v3963_v26 }
0x132e   : > { %5398 = shalt.err (!%p5395_p3)
}
0x132f   : > { %s5399_s7 = scalar_lea.hbm %s3995_s8, 128  ;;  %s5403_s23 = scalar_lea.hbm %s6535_s4, 256 }
0x1330   : > { %p5400_p11 = scmp.ne.s32.totalorder %s3995_s8, %s5399_s7  ;;  %p5404_p4 = scmp.lt.s32.totalorder %s3995_s8, %s6535_s4 }
0x1331   : > { %p5405_p0 = scmp.lt.s32.totalorder %s5403_s23, %s5399_s7 }
0x1332   : > { %p5401_p10 = pnand %p5400_p11, %p6528_p2 }
0x1333   : > { %p5406_p1 = por %p5405_p0, %p5404_p4 }
0x1334   : > { %p5402_p5 = pneg %p5401_p10 }
0x1336   : > { %p5407_p8 = pnand %p5406_p1, %p5402_p5 }
0x1338   : > { %5410 = shalt.err (!%p5407_p8)
}
0x1339   : > { %4761 = dma.vmem_to_hbm [thread:$0]  (%p6528_p2), %s3998_s1, 128, %s3995_s8, %s3974_s3  }
0x133a PF: > { %s6536_s0 = sld [smem:[#allocation41_spill]]  ;;  %p6539_p7 = scmp.ge.s32.totalorder %s5485_s28, 2 }
0x133b   : > { %s6537_s2 = sld [smem:[#allocation45_spill]] }
0x1340   : > { %s4041_s30 = sand.u32 1, %s6536_s0  }
0x1341   : > { %p6538_p6 = scmp.ne.s32.totalorder %s6537_s2, 0  ;;  %s4042_s9 = scalar_lea.sflag [#allocation4], %s4041_s30 }
0x1343   : > { %p4815_p9 = pnand %p6539_p7, %p6538_p6 }
0x1345   : > { %p4816_p12 = pneg %p4815_p9 }
0x1347   : > { %5464 = dma.done.wait (%p4816_p12), %s4042_s9, 128  }
0x1348   : > { %5466 = vsyncadd (%p4816_p12), %s4042_s9, 4294967168  ;;  %s6540_s12 = sadd.s32 4294967294, %s5485_s28  }
0x1349   : > { %s4050_s19 = sand.u32 1, %s6540_s12  }
0x134a   : > { %s4051_s11 = scalar_lea.sflag [#allocation28], %s4050_s19 }
0x134b   : > { %5468 = dma.done.wait (%p4816_p12), %s4051_s11, 1024  }
0x134c   : > { %5470 = vsyncadd (%p4816_p12), %s4051_s11, 4294966272  ;;  %s6541_s28 = sld [smem:[#allocation42_spill]]  ;;  %s6543_s5 = smov %s5477_s26 }
0x134d   : > { %s6542_s22 = sld [smem:[#allocation43_spill]]  ;;  %s6544_s26 = smov %s5481_s27 }
0x1352   : > { %p52_p2 = scmp.ge.s32.totalorder %s6541_s28, 4  }
0x1353   : > { %s6545_s27 = smov %s6542_s22 }
0x1354   :  { %54 = sbr.rel (!%p52_p2) target bundleno = 39 (0x27), region = 266 }
0x1359   :  { %4065 = vsyncpa [#allocation3], 1 }
0x135a   :  { %4067 = vsyncpa [#allocation3 + $0x1], 1 }
0x135b   :  { %4068 = vsyncpa [#allocation6], 1 }
0x135c   :  { %4070 = vsyncpa [#allocation6 + $0x1], 1 }
0x135d   :  { %4071 = vsyncpa [#allocation9], 1 }
0x135e   :  { %4073 = vsyncpa [#allocation9 + $0x1], 1 }
0x135f   :  { %4074 = vsyncpa [#allocation12], 1 }
0x1360   :  { %4075 = vsyncpa [#allocation15], 1 }
0x1361   :  { %4076 = vsyncpa [#allocation18], 1 }
0x1362   :  { %4077 = vsyncpa [#allocation21], 1 }
0x1363   :  { %4078 = vsyncpa [#allocation24], 1 }
0x1364   :  { %4079 = vsyncpa [#allocation4], 1 }
0x1365   :  { %4081 = vsyncpa [#allocation4 + $0x1], 1 }
0x1366   :  { %4082 = vsyncpa [#allocation28], 1 }
0x1367   :  { %4084 = vsyncpa [#allocation28 + $0x1], 1 }

</bundles_post_ra>
